<compile_context>
chip_gen: v6e
topology: v6e:2x2x1
jax: 0.10.0
libtpu: 0.0.40
codegen_flags: <defaults>
</compile_context>

<pallas_src>
from functools import partial

import jax
import jax.numpy as jnp
import numpy as np
from jax import lax
from jax.experimental import pallas as pl
from jax.experimental.pallas import tpu as pltpu


def _graph_nonlocal_kernel(x_ref, pw_ref, pb_ref, wt_ref, scale_ref, shift_ref, o_ref,
                           *, grouped, group_size, mxu_dtype):
    """One (BT, N, C) batch block per grid step."""
    BT, N, C = x_ref.shape
    Ci = wt_ref.shape[0]            # inter channels
    G = group_size
    NG = N // G
    # f32 operands get full-precision MXU passes; with bf16 operands DEFAULT is already exact.
    prec = lax.Precision.DEFAULT if mxu_dtype is not None else lax.Precision.HIGHEST

    x = x_ref[...].reshape(BT * N, C)                                   # (BT*N, C), f32
    x_mm = x.astype(mxu_dtype) if mxu_dtype is not None else x

    # Fused 1x1 convs [phi | g | theta]: one MXU matmul, weights pre-transposed in the wrapper.
    proj = jnp.dot(x_mm, pw_ref[...], precision=prec,
                   preferred_element_type=jnp.float32) + pb_ref[...]
    pg = proj[:, :2 * Ci]           # (BT*N, 2*Ci)  phi|g  (lane-tile aligned slice)
    theta = proj[:, 2 * Ci:]        # (BT*N, Ci)

    # grouped_order gather + MaxPool1d(G), fused as static row slices + running max on the
    # VPU (grouped_order is a compile-time constant -> no selector operand, no MXU pushes).
    pooled_rows = []
    for b in range(BT):
        base = b * N
        for i in range(NG):
            j0 = base + grouped[i * G]
            r = pg[j0:j0 + 1, :]
            for k in range(1, G):
                j = base + grouped[i * G + k]
                r = jnp.maximum(r, pg[j:j + 1, :])
            pooled_rows.append(r)
    pooled = jnp.concatenate(pooled_rows, axis=0)                       # (BT*NG, 2*Ci)

    # Attention, one batch element at a time: keeps everything 2-D (no NG<8 sublane reshapes).
    ys = []
    for b in range(BT):
        th = theta[b * N:(b + 1) * N, :]                                # (N, Ci)
        ph = pooled[b * NG:(b + 1) * NG, :Ci]                           # (NG, Ci)
        gp = pooled[b * NG:(b + 1) * NG, Ci:]                           # (NG, Ci)
        f = lax.dot_general(th, ph, (((1,), (1,)), ((), ())),           # (N, NG), MXU K=Ci
                            precision=prec, preferred_element_type=jnp.float32)
        f = f - jnp.max(f, axis=-1, keepdims=True)
        e = jnp.exp(f)
        attn = e / jnp.sum(e, axis=-1, keepdims=True)                   # exact softmax
        # K = NG (tiny, static) contraction: VPU weighted sum of pooled g rows instead of a
        # nearly-empty depth-NG MXU push.
        y = attn[:, 0:1] * gp[0:1, :]
        for m in range(1, NG):
            y = y + attn[:, m:m + 1] * gp[m:m + 1, :]
        ys.append(y)
    y2 = jnp.concatenate(ys, axis=0)                                    # (BT*N, Ci)
    y_mm = y2.astype(mxu_dtype) if mxu_dtype is not None else y2

    # W (1x1 conv, pre-transposed) + folded eval-mode BN (w_b folded into shift) + residual.
    wy = jnp.dot(y_mm, wt_ref[...], precision=prec, preferred_element_type=jnp.float32)
    z = x + wy * scale_ref[...] + shift_ref[...]
    o_ref[...] = z.reshape(BT, N, C).astype(o_ref.dtype)


def _pick_bt(B, N):
    """Batch elements per grid step.

    Single grid step unless there is enough work to keep both v7x TensorCores busy
    (>= ~256 matmul rows per core).  v5e/v6e are single-TC, so extra grid steps only add
    ~0.35 us/step pipeline overhead and halve MXU row fill.
    """
    if B * N < 512:
        return B
    bt = max(1, min(B, 256 // max(N, 1)))
    while B % bt:
        bt -= 1
    return bt


def graph_nonlocal_pallas(x, params, grouped_order, restored_order, group_size,
                          mxu_dtype=None):
    B, N, C = x.shape
    Ci = params["theta_w"].shape[0]
    G = int(group_size)
    assert N % G == 0
    BT = _pick_bt(B, N)

    grouped = tuple(int(v) for v in np.asarray(grouped_order))
    restored = np.asarray(restored_order, dtype=np.int64)

    # Fused, pre-transposed projection weight [phi | g | theta] : (C, 3*Ci); one bias row.
    pw = jnp.concatenate(
        [params["phi_w"].T, params["g_w"].T, params["theta_w"].T], axis=1)
    pb = jnp.concatenate(
        [params["phi_b"], params["g_b"], params["theta_b"]]).reshape(1, 3 * Ci)
    wt = params["w_w"].T                                     # (Ci, C), pre-transposed

    # Eval-mode BN folding; w_b is folded into the shift (drops one operand + one VPU add).
    # TODO(synk): BatchNorm1d is folded in eval mode (running stats); training-mode batch
    # statistics are not computed in-kernel.
    eps = 1e-5
    scale = params["bn_gamma"] / jnp.sqrt(params["bn_var"] + eps)
    shift = params["bn_beta"] - params["bn_mean"] * scale + params["w_b"] * scale
    scale = scale.reshape(1, C).astype(jnp.float32)
    shift = shift.reshape(1, C).astype(jnp.float32)

    if mxu_dtype is not None:      # optional bf16 MXU inputs (v6e/v7x); accumulation stays f32
        pw = pw.astype(mxu_dtype)
        wt = wt.astype(mxu_dtype)

    kernel = partial(_graph_nonlocal_kernel, grouped=grouped, group_size=G,
                     mxu_dtype=mxu_dtype)
    full2 = lambda b: (0, 0)       # noqa: E731

    out = pl.pallas_call(
        kernel,
        out_shape=jax.ShapeDtypeStruct((B, N, C), x.dtype),
        grid=(B // BT,),
        in_specs=[
            pl.BlockSpec((BT, N, C), lambda b: (b, 0, 0)),   # x
            pl.BlockSpec((C, 3 * Ci), full2),                # fused [phi|g|theta] weight
            pl.BlockSpec((1, 3 * Ci), full2),                # fused bias row
            pl.BlockSpec((Ci, C), full2),                    # W weight (pre-transposed)
            pl.BlockSpec((1, C), full2),                     # folded BN scale
            pl.BlockSpec((1, C), full2),                     # folded BN shift (+ w_b)
        ],
        out_specs=pl.BlockSpec((BT, N, C), lambda b: (b, 0, 0)),
        compiler_params=pltpu.CompilerParams(dimension_semantics=("parallel",)),
    )(x, pw, pb, wt, scale, shift)

    # Combined output permutation Q = grouped∘restored.  Identity when restored_order is the
    # inverse of grouped_order (the SemGCN case) -> skipped.  Otherwise it's layout-only, so
    # apply it as a static wrapper-side take, never as a dense in-kernel permutation matmul.
    qperm = np.asarray(grouped)[restored]
    if not np.array_equal(qperm, np.arange(N)):
        out = out[:, qperm, :]
    return out


def graph_nonlocal_reference(x, params, grouped_order, restored_order, group_size):
    """Pure-JAX mirror of the PyTorch forward (NCHW-style, high-precision, for validation)."""
    hp = lax.Precision.HIGHEST
    xg = x[:, grouped_order, :]
    xt = jnp.transpose(xg, (0, 2, 1))               # (B, C, N) — Conv1d layout

    def conv1(w, b, inp):                           # 1x1 Conv1d
        return jnp.einsum("oc,bcn->bon", w, inp, precision=hp) + b[None, :, None]

    theta = conv1(params["theta_w"], params["theta_b"], xt)
    phi = conv1(params["phi_w"], params["phi_b"], xt)
    g = conv1(params["g_w"], params["g_b"], xt)
    B, Ci, N = theta.shape
    G = group_size
    phi = jnp.max(phi.reshape(B, Ci, N // G, G), axis=-1)   # MaxPool1d(G)
    g = jnp.max(g.reshape(B, Ci, N // G, G), axis=-1)

    theta_x = jnp.transpose(theta, (0, 2, 1))       # (B, N, Ci)
    g_x = jnp.transpose(g, (0, 2, 1))               # (B, NG, Ci)
    f = jnp.einsum("bnc,bcm->bnm", theta_x, phi, precision=hp)   # (B, N, NG)
    f = jax.nn.softmax(f, axis=-1)
    y = jnp.einsum("bnm,bmc->bnc", f, g_x, precision=hp)         # (B, N, Ci)
    yt = jnp.transpose(y, (0, 2, 1))                # (B, Ci, N)
    wy = jnp.einsum("oc,bcn->bon", params["w_w"], yt,
                    precision=hp) + params["w_b"][None, :, None]

    eps = 1e-5
    scale = params["bn_gamma"] / jnp.sqrt(params["bn_var"] + eps)
    shift = params["bn_beta"] - params["bn_mean"] * scale
    wy = wy * scale[None, :, None] + shift[None, :, None]
    z = wy + xt
    out = jnp.transpose(z, (0, 2, 1))
    return out[:, restored_order, :]


if __name__ == "__main__":
    # SemGCN-like small config: 16 joints, hid_dim=128 (lane-dense channels), groups of 4.
    B, N, C = 2, 16, 128
    group_size = 4
    C_i = C // 2                    # inter_channels = hid_dim // 2

    key = jax.random.PRNGKey(0)
    keys = jax.random.split(key, 12)

    x = jax.random.normal(keys[0], (B, N, C), dtype=jnp.float32)

    params = {
        "theta_w": jax.random.normal(keys[1], (C_i, C), jnp.float32) * 0.1,
        "theta_b": jax.random.normal(keys[2], (C_i,), jnp.float32) * 0.1,
        "phi_w": jax.random.normal(keys[3], (C_i, C), jnp.float32) * 0.1,
        "phi_b": jax.random.normal(keys[4], (C_i,), jnp.float32) * 0.1,
        "g_w": jax.random.normal(keys[5], (C_i, C), jnp.float32) * 0.1,
        "g_b": jax.random.normal(keys[6], (C_i,), jnp.float32) * 0.1,
        "w_w": jax.random.normal(keys[7], (C, C_i), jnp.float32) * 0.1,
        "w_b": jax.random.normal(keys[8], (C,), jnp.float32) * 0.1,
        # BN (eval mode) — use non-trivial values to exercise the folded affine.
        "bn_gamma": 1.0 + 0.1 * jax.random.normal(keys[9], (C,), jnp.float32),
        "bn_beta": 0.1 * jax.random.normal(keys[10], (C,), jnp.float32),
        "bn_mean": 0.05 * jax.random.normal(keys[11], (C,), jnp.float32),
        "bn_var": jnp.ones((C,), jnp.float32),
    }

    # Deterministic node regrouping and its inverse (the module's __init__ args).
    grouped_order = np.random.RandomState(0).permutation(N).astype(np.int32)
    restored_order = np.argsort(grouped_order).astype(np.int32)

    out = graph_nonlocal_pallas(x, params, grouped_order, restored_order, group_size)
    out = jax.block_until_ready(out)

    ref = graph_nonlocal_reference(x, params, jnp.asarray(grouped_order),
                                   jnp.asarray(restored_order), group_size)
    np.testing.assert_allclose(np.asarray(out), np.asarray(ref), rtol=1e-3, atol=1e-3)

    # Also exercise the general restored_order path (Q != identity -> wrapper-side static take).
    restored2 = np.roll(np.arange(N), 3).astype(np.int32)
    out2 = jax.block_until_ready(
        graph_nonlocal_pallas(x, params, grouped_order, restored2, group_size))
    ref2 = graph_nonlocal_reference(x, params, jnp.asarray(grouped_order),
                                    jnp.asarray(restored2), group_size)
    np.testing.assert_allclose(np.asarray(out2), np.asarray(ref2), rtol=1e-3, atol=1e-3)

    print("KERNEL_OK")
</pallas_src>

<mosaic_0001>
module attributes {stable_mosaic.version = 11 : i64} {
  func.func @_graph_nonlocal_kernel(%arg0: i32, %arg1: memref<2x16x128xf32, #tpu.memory_space<vmem>>, %arg2: memref<128x192xf32, #tpu.memory_space<vmem>>, %arg3: memref<1x192xf32, #tpu.memory_space<vmem>>, %arg4: memref<64x128xf32, #tpu.memory_space<vmem>>, %arg5: memref<1x128xf32, #tpu.memory_space<vmem>>, %arg6: memref<1x128xf32, #tpu.memory_space<vmem>>, %arg7: memref<2x16x128xf32, #tpu.memory_space<vmem>>) attributes {dimension_semantics = [#tpu.dimension_semantics<parallel>], iteration_bounds = array<i64: 1>, scalar_prefetch = 0 : i64, scratch_operands = 0 : i64, tpu.core_type = #tpu.core_type<tc>, window_params = [{transform_indices = @transform_0, window_bounds = array<i64: 2, 16, 128>}, {pipeline_mode = #tpu.pipeline_mode<synchronous>, transform_indices = @transform_1, window_bounds = array<i64: 128, 192>}, {pipeline_mode = #tpu.pipeline_mode<synchronous>, transform_indices = @transform_2, window_bounds = array<i64: 1, 192>}, {pipeline_mode = #tpu.pipeline_mode<synchronous>, transform_indices = @transform_3, window_bounds = array<i64: 64, 128>}, {pipeline_mode = #tpu.pipeline_mode<synchronous>, transform_indices = @transform_4, window_bounds = array<i64: 1, 128>}, {pipeline_mode = #tpu.pipeline_mode<synchronous>, transform_indices = @transform_5, window_bounds = array<i64: 1, 128>}, {transform_indices = @transform_6, window_bounds = array<i64: 2, 16, 128>}]} {
    %c0 = arith.constant 0 : index
    %c0_0 = arith.constant 0 : index
    %c0_1 = arith.constant 0 : index
    %0 = vector.load %arg1[%c0, %c0_0, %c0_1] : memref<2x16x128xf32, #tpu.memory_space<vmem>>, vector<2x16x128xf32>
    %1 = vector.shape_cast %0 : vector<2x16x128xf32> to vector<32x128xf32>
    %c0_2 = arith.constant 0 : index
    %c0_3 = arith.constant 0 : index
    %2 = vector.load %arg2[%c0_2, %c0_3] : memref<128x192xf32, #tpu.memory_space<vmem>>, vector<128x192xf32>
    %cst = arith.constant dense<0.000000e+00> : vector<32x192xf32>
    %3 = tpu.matmul %1, %2, %cst {dimension_numbers = #tpu.dot_dimension_numbers<[1], [0], [0], [1], [0, 0, 1, 1], [], []>, precision = #tpu.contract_precision<fp32>} : vector<32x128xf32>, vector<128x192xf32>, vector<32x192xf32> -> vector<32x192xf32>
    %c0_4 = arith.constant 0 : index
    %c0_5 = arith.constant 0 : index
    %4 = vector.load %arg3[%c0_4, %c0_5] : memref<1x192xf32, #tpu.memory_space<vmem>>, vector<1x192xf32>
    %5 = vector.broadcast %4 : vector<1x192xf32> to vector<32x192xf32>
    %6 = arith.addf %3, %5 : vector<32x192xf32>
    %7 = vector.extract_strided_slice %6 {offsets = [0, 0], sizes = [32, 128], strides = [1, 1]} : vector<32x192xf32> to vector<32x128xf32>
    %8 = vector.extract_strided_slice %6 {offsets = [0, 128], sizes = [32, 64], strides = [1, 1]} : vector<32x192xf32> to vector<32x64xf32>
    %9 = vector.extract_strided_slice %7 {offsets = [1, 0], sizes = [1, 128], strides = [1, 1]} : vector<32x128xf32> to vector<1x128xf32>
    %10 = vector.extract_strided_slice %7 {offsets = [6, 0], sizes = [1, 128], strides = [1, 1]} : vector<32x128xf32> to vector<1x128xf32>
    %11 = arith.maximumf %9, %10 : vector<1x128xf32>
    %12 = vector.extract_strided_slice %7 {offsets = [8, 0], sizes = [1, 128], strides = [1, 1]} : vector<32x128xf32> to vector<1x128xf32>
    %13 = arith.maximumf %11, %12 : vector<1x128xf32>
    %14 = vector.extract_strided_slice %7 {offsets = [9, 0], sizes = [1, 128], strides = [1, 1]} : vector<32x128xf32> to vector<1x128xf32>
    %15 = arith.maximumf %13, %14 : vector<1x128xf32>
    %16 = vector.extract_strided_slice %7 {offsets = [13, 0], sizes = [1, 128], strides = [1, 1]} : vector<32x128xf32> to vector<1x128xf32>
    %17 = vector.extract_strided_slice %7 {offsets = [4, 0], sizes = [1, 128], strides = [1, 1]} : vector<32x128xf32> to vector<1x128xf32>
    %18 = arith.maximumf %16, %17 : vector<1x128xf32>
    %19 = vector.extract_strided_slice %7 {offsets = [2, 0], sizes = [1, 128], strides = [1, 1]} : vector<32x128xf32> to vector<1x128xf32>
    %20 = arith.maximumf %18, %19 : vector<1x128xf32>
    %21 = vector.extract_strided_slice %7 {offsets = [14, 0], sizes = [1, 128], strides = [1, 1]} : vector<32x128xf32> to vector<1x128xf32>
    %22 = arith.maximumf %20, %21 : vector<1x128xf32>
    %23 = vector.extract_strided_slice %7 {offsets = [10, 0], sizes = [1, 128], strides = [1, 1]} : vector<32x128xf32> to vector<1x128xf32>
    %24 = vector.extract_strided_slice %7 {offsets = [7, 0], sizes = [1, 128], strides = [1, 1]} : vector<32x128xf32> to vector<1x128xf32>
    %25 = arith.maximumf %23, %24 : vector<1x128xf32>
    %26 = vector.extract_strided_slice %7 {offsets = [15, 0], sizes = [1, 128], strides = [1, 1]} : vector<32x128xf32> to vector<1x128xf32>
    %27 = arith.maximumf %25, %26 : vector<1x128xf32>
    %28 = vector.extract_strided_slice %7 {offsets = [11, 0], sizes = [1, 128], strides = [1, 1]} : vector<32x128xf32> to vector<1x128xf32>
    %29 = arith.maximumf %27, %28 : vector<1x128xf32>
    %30 = vector.extract_strided_slice %7 {offsets = [3, 0], sizes = [1, 128], strides = [1, 1]} : vector<32x128xf32> to vector<1x128xf32>
    %31 = vector.extract_strided_slice %7 {offsets = [0, 0], sizes = [1, 128], strides = [1, 1]} : vector<32x128xf32> to vector<1x128xf32>
    %32 = arith.maximumf %30, %31 : vector<1x128xf32>
    %33 = vector.extract_strided_slice %7 {offsets = [5, 0], sizes = [1, 128], strides = [1, 1]} : vector<32x128xf32> to vector<1x128xf32>
    %34 = arith.maximumf %32, %33 : vector<1x128xf32>
    %35 = vector.extract_strided_slice %7 {offsets = [12, 0], sizes = [1, 128], strides = [1, 1]} : vector<32x128xf32> to vector<1x128xf32>
    %36 = arith.maximumf %34, %35 : vector<1x128xf32>
    %37 = vector.extract_strided_slice %7 {offsets = [17, 0], sizes = [1, 128], strides = [1, 1]} : vector<32x128xf32> to vector<1x128xf32>
    %38 = vector.extract_strided_slice %7 {offsets = [22, 0], sizes = [1, 128], strides = [1, 1]} : vector<32x128xf32> to vector<1x128xf32>
    %39 = arith.maximumf %37, %38 : vector<1x128xf32>
    %40 = vector.extract_strided_slice %7 {offsets = [24, 0], sizes = [1, 128], strides = [1, 1]} : vector<32x128xf32> to vector<1x128xf32>
    %41 = arith.maximumf %39, %40 : vector<1x128xf32>
    %42 = vector.extract_strided_slice %7 {offsets = [25, 0], sizes = [1, 128], strides = [1, 1]} : vector<32x128xf32> to vector<1x128xf32>
    %43 = arith.maximumf %41, %42 : vector<1x128xf32>
    %44 = vector.extract_strided_slice %7 {offsets = [29, 0], sizes = [1, 128], strides = [1, 1]} : vector<32x128xf32> to vector<1x128xf32>
    %45 = vector.extract_strided_slice %7 {offsets = [20, 0], sizes = [1, 128], strides = [1, 1]} : vector<32x128xf32> to vector<1x128xf32>
    %46 = arith.maximumf %44, %45 : vector<1x128xf32>
    %47 = vector.extract_strided_slice %7 {offsets = [18, 0], sizes = [1, 128], strides = [1, 1]} : vector<32x128xf32> to vector<1x128xf32>
    %48 = arith.maximumf %46, %47 : vector<1x128xf32>
    %49 = vector.extract_strided_slice %7 {offsets = [30, 0], sizes = [1, 128], strides = [1, 1]} : vector<32x128xf32> to vector<1x128xf32>
    %50 = arith.maximumf %48, %49 : vector<1x128xf32>
    %51 = vector.extract_strided_slice %7 {offsets = [26, 0], sizes = [1, 128], strides = [1, 1]} : vector<32x128xf32> to vector<1x128xf32>
    %52 = vector.extract_strided_slice %7 {offsets = [23, 0], sizes = [1, 128], strides = [1, 1]} : vector<32x128xf32> to vector<1x128xf32>
    %53 = arith.maximumf %51, %52 : vector<1x128xf32>
    %54 = vector.extract_strided_slice %7 {offsets = [31, 0], sizes = [1, 128], strides = [1, 1]} : vector<32x128xf32> to vector<1x128xf32>
    %55 = arith.maximumf %53, %54 : vector<1x128xf32>
    %56 = vector.extract_strided_slice %7 {offsets = [27, 0], sizes = [1, 128], strides = [1, 1]} : vector<32x128xf32> to vector<1x128xf32>
    %57 = arith.maximumf %55, %56 : vector<1x128xf32>
    %58 = vector.extract_strided_slice %7 {offsets = [19, 0], sizes = [1, 128], strides = [1, 1]} : vector<32x128xf32> to vector<1x128xf32>
    %59 = vector.extract_strided_slice %7 {offsets = [16, 0], sizes = [1, 128], strides = [1, 1]} : vector<32x128xf32> to vector<1x128xf32>
    %60 = arith.maximumf %58, %59 : vector<1x128xf32>
    %61 = vector.extract_strided_slice %7 {offsets = [21, 0], sizes = [1, 128], strides = [1, 1]} : vector<32x128xf32> to vector<1x128xf32>
    %62 = arith.maximumf %60, %61 : vector<1x128xf32>
    %63 = vector.extract_strided_slice %7 {offsets = [28, 0], sizes = [1, 128], strides = [1, 1]} : vector<32x128xf32> to vector<1x128xf32>
    %64 = arith.maximumf %62, %63 : vector<1x128xf32>
    %65 = tpu.concatenate %15, %22, %29, %36, %43, %50, %57, %64 in 0 : vector<1x128xf32>, vector<1x128xf32>, vector<1x128xf32>, vector<1x128xf32>, vector<1x128xf32>, vector<1x128xf32>, vector<1x128xf32>, vector<1x128xf32> -> vector<8x128xf32>
    %66 = vector.extract_strided_slice %8 {offsets = [0, 0], sizes = [16, 64], strides = [1, 1]} : vector<32x64xf32> to vector<16x64xf32>
    %67 = vector.extract_strided_slice %65 {offsets = [0, 0], sizes = [4, 64], strides = [1, 1]} : vector<8x128xf32> to vector<4x64xf32>
    %68 = vector.extract_strided_slice %65 {offsets = [0, 64], sizes = [4, 64], strides = [1, 1]} : vector<8x128xf32> to vector<4x64xf32>
    %cst_6 = arith.constant dense<0.000000e+00> : vector<16x4xf32>
    %69 = tpu.matmul %66, %67, %cst_6 {dimension_numbers = #tpu.dot_dimension_numbers<[1], [1], [0], [0], [0, 0, 1, 0], [], []>, precision = #tpu.contract_precision<fp32>} : vector<16x64xf32>, vector<4x64xf32>, vector<16x4xf32> -> vector<16x4xf32>
    %cst_7 = arith.constant dense<0xFF800000> : vector<16xf32>
    %70 = vector.multi_reduction <maximumf>, %69, %cst_7 [1] : vector<16x4xf32> to vector<16xf32>
    %71 = vector.shape_cast %70 : vector<16xf32> to vector<16x1xf32>
    %72 = vector.broadcast %71 : vector<16x1xf32> to vector<16x4xf32>
    %73 = arith.subf %69, %72 : vector<16x4xf32>
    %74 = math.exp %73 : vector<16x4xf32>
    %cst_8 = arith.constant dense<0.000000e+00> : vector<16xf32>
    %75 = vector.multi_reduction <add>, %74, %cst_8 [1] : vector<16x4xf32> to vector<16xf32>
    %76 = vector.shape_cast %75 : vector<16xf32> to vector<16x1xf32>
    %77 = vector.broadcast %76 : vector<16x1xf32> to vector<16x4xf32>
    %78 = arith.divf %74, %77 : vector<16x4xf32>
    %79 = vector.extract_strided_slice %78 {offsets = [0, 0], sizes = [16, 1], strides = [1, 1]} : vector<16x4xf32> to vector<16x1xf32>
    %80 = vector.extract_strided_slice %68 {offsets = [0, 0], sizes = [1, 64], strides = [1, 1]} : vector<4x64xf32> to vector<1x64xf32>
    %81 = vector.broadcast %79 : vector<16x1xf32> to vector<16x64xf32>
    %82 = vector.broadcast %80 : vector<1x64xf32> to vector<16x64xf32>
    %83 = arith.mulf %81, %82 : vector<16x64xf32>
    %84 = vector.extract_strided_slice %78 {offsets = [0, 1], sizes = [16, 1], strides = [1, 1]} : vector<16x4xf32> to vector<16x1xf32>
    %85 = vector.extract_strided_slice %68 {offsets = [1, 0], sizes = [1, 64], strides = [1, 1]} : vector<4x64xf32> to vector<1x64xf32>
    %86 = vector.broadcast %84 : vector<16x1xf32> to vector<16x64xf32>
    %87 = vector.broadcast %85 : vector<1x64xf32> to vector<16x64xf32>
    %88 = arith.mulf %86, %87 : vector<16x64xf32>
    %89 = arith.addf %83, %88 : vector<16x64xf32>
    %90 = vector.extract_strided_slice %78 {offsets = [0, 2], sizes = [16, 1], strides = [1, 1]} : vector<16x4xf32> to vector<16x1xf32>
    %91 = vector.extract_strided_slice %68 {offsets = [2, 0], sizes = [1, 64], strides = [1, 1]} : vector<4x64xf32> to vector<1x64xf32>
    %92 = vector.broadcast %90 : vector<16x1xf32> to vector<16x64xf32>
    %93 = vector.broadcast %91 : vector<1x64xf32> to vector<16x64xf32>
    %94 = arith.mulf %92, %93 : vector<16x64xf32>
    %95 = arith.addf %89, %94 : vector<16x64xf32>
    %96 = vector.extract_strided_slice %78 {offsets = [0, 3], sizes = [16, 1], strides = [1, 1]} : vector<16x4xf32> to vector<16x1xf32>
    %97 = vector.extract_strided_slice %68 {offsets = [3, 0], sizes = [1, 64], strides = [1, 1]} : vector<4x64xf32> to vector<1x64xf32>
    %98 = vector.broadcast %96 : vector<16x1xf32> to vector<16x64xf32>
    %99 = vector.broadcast %97 : vector<1x64xf32> to vector<16x64xf32>
    %100 = arith.mulf %98, %99 : vector<16x64xf32>
    %101 = arith.addf %95, %100 : vector<16x64xf32>
    %102 = vector.extract_strided_slice %8 {offsets = [16, 0], sizes = [16, 64], strides = [1, 1]} : vector<32x64xf32> to vector<16x64xf32>
    %103 = vector.extract_strided_slice %65 {offsets = [4, 0], sizes = [4, 64], strides = [1, 1]} : vector<8x128xf32> to vector<4x64xf32>
    %104 = vector.extract_strided_slice %65 {offsets = [4, 64], sizes = [4, 64], strides = [1, 1]} : vector<8x128xf32> to vector<4x64xf32>
    %cst_9 = arith.constant dense<0.000000e+00> : vector<16x4xf32>
    %105 = tpu.matmul %102, %103, %cst_9 {dimension_numbers = #tpu.dot_dimension_numbers<[1], [1], [0], [0], [0, 0, 1, 0], [], []>, precision = #tpu.contract_precision<fp32>} : vector<16x64xf32>, vector<4x64xf32>, vector<16x4xf32> -> vector<16x4xf32>
    %cst_10 = arith.constant dense<0xFF800000> : vector<16xf32>
    %106 = vector.multi_reduction <maximumf>, %105, %cst_10 [1] : vector<16x4xf32> to vector<16xf32>
    %107 = vector.shape_cast %106 : vector<16xf32> to vector<16x1xf32>
    %108 = vector.broadcast %107 : vector<16x1xf32> to vector<16x4xf32>
    %109 = arith.subf %105, %108 : vector<16x4xf32>
    %110 = math.exp %109 : vector<16x4xf32>
    %cst_11 = arith.constant dense<0.000000e+00> : vector<16xf32>
    %111 = vector.multi_reduction <add>, %110, %cst_11 [1] : vector<16x4xf32> to vector<16xf32>
    %112 = vector.shape_cast %111 : vector<16xf32> to vector<16x1xf32>
    %113 = vector.broadcast %112 : vector<16x1xf32> to vector<16x4xf32>
    %114 = arith.divf %110, %113 : vector<16x4xf32>
    %115 = vector.extract_strided_slice %114 {offsets = [0, 0], sizes = [16, 1], strides = [1, 1]} : vector<16x4xf32> to vector<16x1xf32>
    %116 = vector.extract_strided_slice %104 {offsets = [0, 0], sizes = [1, 64], strides = [1, 1]} : vector<4x64xf32> to vector<1x64xf32>
    %117 = vector.broadcast %115 : vector<16x1xf32> to vector<16x64xf32>
    %118 = vector.broadcast %116 : vector<1x64xf32> to vector<16x64xf32>
    %119 = arith.mulf %117, %118 : vector<16x64xf32>
    %120 = vector.extract_strided_slice %114 {offsets = [0, 1], sizes = [16, 1], strides = [1, 1]} : vector<16x4xf32> to vector<16x1xf32>
    %121 = vector.extract_strided_slice %104 {offsets = [1, 0], sizes = [1, 64], strides = [1, 1]} : vector<4x64xf32> to vector<1x64xf32>
    %122 = vector.broadcast %120 : vector<16x1xf32> to vector<16x64xf32>
    %123 = vector.broadcast %121 : vector<1x64xf32> to vector<16x64xf32>
    %124 = arith.mulf %122, %123 : vector<16x64xf32>
    %125 = arith.addf %119, %124 : vector<16x64xf32>
    %126 = vector.extract_strided_slice %114 {offsets = [0, 2], sizes = [16, 1], strides = [1, 1]} : vector<16x4xf32> to vector<16x1xf32>
    %127 = vector.extract_strided_slice %104 {offsets = [2, 0], sizes = [1, 64], strides = [1, 1]} : vector<4x64xf32> to vector<1x64xf32>
    %128 = vector.broadcast %126 : vector<16x1xf32> to vector<16x64xf32>
    %129 = vector.broadcast %127 : vector<1x64xf32> to vector<16x64xf32>
    %130 = arith.mulf %128, %129 : vector<16x64xf32>
    %131 = arith.addf %125, %130 : vector<16x64xf32>
    %132 = vector.extract_strided_slice %114 {offsets = [0, 3], sizes = [16, 1], strides = [1, 1]} : vector<16x4xf32> to vector<16x1xf32>
    %133 = vector.extract_strided_slice %104 {offsets = [3, 0], sizes = [1, 64], strides = [1, 1]} : vector<4x64xf32> to vector<1x64xf32>
    %134 = vector.broadcast %132 : vector<16x1xf32> to vector<16x64xf32>
    %135 = vector.broadcast %133 : vector<1x64xf32> to vector<16x64xf32>
    %136 = arith.mulf %134, %135 : vector<16x64xf32>
    %137 = arith.addf %131, %136 : vector<16x64xf32>
    %138 = tpu.concatenate %101, %137 in 0 : vector<16x64xf32>, vector<16x64xf32> -> vector<32x64xf32>
    %c0_12 = arith.constant 0 : index
    %c0_13 = arith.constant 0 : index
    %139 = vector.load %arg4[%c0_12, %c0_13] : memref<64x128xf32, #tpu.memory_space<vmem>>, vector<64x128xf32>
    %cst_14 = arith.constant dense<0.000000e+00> : vector<32x128xf32>
    %140 = tpu.matmul %138, %139, %cst_14 {dimension_numbers = #tpu.dot_dimension_numbers<[1], [0], [0], [1], [0, 0, 1, 1], [], []>, precision = #tpu.contract_precision<fp32>} : vector<32x64xf32>, vector<64x128xf32>, vector<32x128xf32> -> vector<32x128xf32>
    %c0_15 = arith.constant 0 : index
    %c0_16 = arith.constant 0 : index
    %141 = vector.load %arg5[%c0_15, %c0_16] : memref<1x128xf32, #tpu.memory_space<vmem>>, vector<1x128xf32>
    %142 = vector.broadcast %141 : vector<1x128xf32> to vector<32x128xf32>
    %143 = arith.mulf %140, %142 : vector<32x128xf32>
    %144 = arith.addf %1, %143 : vector<32x128xf32>
    %c0_17 = arith.constant 0 : index
    %c0_18 = arith.constant 0 : index
    %145 = vector.load %arg6[%c0_17, %c0_18] : memref<1x128xf32, #tpu.memory_space<vmem>>, vector<1x128xf32>
    %146 = vector.broadcast %145 : vector<1x128xf32> to vector<32x128xf32>
    %147 = arith.addf %144, %146 : vector<32x128xf32>
    %148 = vector.shape_cast %147 : vector<32x128xf32> to vector<2x16x128xf32>
    %c0_19 = arith.constant 0 : index
    %c0_20 = arith.constant 0 : index
    %c0_21 = arith.constant 0 : index
    %149 = vector.load %arg7[%c0_19, %c0_20, %c0_21] : memref<2x16x128xf32, #tpu.memory_space<vmem>>, vector<2x16x128xf32>
    tpu.vector_store %arg7[%c0_19, %c0_20, %c0_21], %148 {strides = array<i32>} : memref<2x16x128xf32, #tpu.memory_space<vmem>>, vector<2x16x128xf32>,
    return
  }
  func.func @transform_0(%arg0: i32) -> (i32, i32, i32) {
    %c0_i32 = arith.constant 0 : i32
    %c0_i32_0 = arith.constant 0 : i32
    %c0_i32_1 = arith.constant 0 : i32
    return %arg0, %c0_i32, %c0_i32_0 : i32, i32, i32
  }
  func.func @transform_1(%arg0: i32) -> (i32, i32) {
    %c0_i32 = arith.constant 0 : i32
    %c0_i32_0 = arith.constant 0 : i32
    %c0_i32_1 = arith.constant 0 : i32
    return %c0_i32, %c0_i32_0 : i32, i32
  }
  func.func @transform_2(%arg0: i32) -> (i32, i32) {
    %c0_i32 = arith.constant 0 : i32
    %c0_i32_0 = arith.constant 0 : i32
    %c0_i32_1 = arith.constant 0 : i32
    return %c0_i32, %c0_i32_0 : i32, i32
  }
  func.func @transform_3(%arg0: i32) -> (i32, i32) {
    %c0_i32 = arith.constant 0 : i32
    %c0_i32_0 = arith.constant 0 : i32
    %c0_i32_1 = arith.constant 0 : i32
    return %c0_i32, %c0_i32_0 : i32, i32
  }
  func.func @transform_4(%arg0: i32) -> (i32, i32) {
    %c0_i32 = arith.constant 0 : i32
    %c0_i32_0 = arith.constant 0 : i32
    %c0_i32_1 = arith.constant 0 : i32
    return %c0_i32, %c0_i32_0 : i32, i32
  }
  func.func @transform_5(%arg0: i32) -> (i32, i32) {
    %c0_i32 = arith.constant 0 : i32
    %c0_i32_0 = arith.constant 0 : i32
    %c0_i32_1 = arith.constant 0 : i32
    return %c0_i32, %c0_i32_0 : i32, i32
  }
  func.func @transform_6(%arg0: i32) -> (i32, i32, i32) {
    %c0_i32 = arith.constant 0 : i32
    %c0_i32_0 = arith.constant 0 : i32
    %c0_i32_1 = arith.constant 0 : i32
    return %arg0, %c0_i32, %c0_i32_0 : i32, i32, i32
  }
}

</mosaic_0001>

<bundles_post_ra>
// kernel: tpu_custom_call.1
= control target key start
LH: loop header
LB: loop body
LE: loop exit
PB: predicated region body
PF: predicated region fallthrough
CT: control target
= control target key end

     0   :  { %v4629_v9 = vmov 0.0   ;;  %s4608_s0 = inlined_call_operand.vmem [shape: f32[2,16,128], index: 0, kind: input, shape index: {}]   ;;  %s4609_s1 = inlined_call_operand.vmem [shape: f32[128,192], index: 1, kind: input, shape index: {}]   ;;  %s4610_s2 = inlined_call_operand.vmem [shape: f32[1,192], index: 2, kind: input, shape index: {}]   ;;  %s4611_s3 = inlined_call_operand.vmem [shape: f32[64,128], index: 3, kind: input, shape index: {}]   ;;  %s4612_s4 = inlined_call_operand.vmem [shape: f32[1,128], index: 4, kind: input, shape index: {}]   ;;  %s4613_s5 = inlined_call_operand.vmem [shape: f32[1,128], index: 5, kind: input, shape index: {}]   ;;  %s4614_s6 = inlined_call_operand.hbm [shape: f32[2,16,128], index: 6, kind: output, shape index: {}]  }
   0x1   :  { %v59_v0 = vld [vmem:[%s4609_s1 + $0xf8] sm:$0xff]  ;;  %v58_v1 = vld [vmem:[%s4609_s1 + $0xf0] sm:$0xff]  ;;  %v57_v2 = vld [vmem:[%s4609_s1 + $0xe8] sm:$0xff]  ;;  %168 = vmatprep.mubr.f32.mxu0 %v4629_v9  ;;  %437 = vmatprep.mubr.f32.mxu1 %v4629_v9 }
   0x2   :  { %v3485_v3 = vand.u32 4294901760, %v59_v0  ;;  %v3487_v4 = vand.u32 4294901760, %v58_v1  ;;  %v3489_v5 = vand.u32 4294901760, %v57_v2  ;;  %v56_v6 = vld [vmem:[%s4609_s1 + $0xe0] sm:$0xff]  ;;  %v55_v7 = vld [vmem:[%s4609_s1 + $0xd8] sm:$0xff]  ;;  %v54_v8 = vld [vmem:[%s4609_s1 + $0xd0] sm:$0xff] }
   0x3   :  { %v3502_v10 = vand.u32 4294901760, %v56_v6  ;;  %v3504_v11 = vand.u32 4294901760, %v55_v7  ;;  %v3506_v12 = vand.u32 4294901760, %v54_v8  ;;  %v53_v13 = vld [vmem:[%s4609_s1 + $0xc8] sm:$0xff]  ;;  %v52_v14 = vld [vmem:[%s4609_s1 + $0xc0] sm:$0xff]  ;;  %v51_v15 = vld [vmem:[%s4609_s1 + $0xb8] sm:$0xff] }
   0x4   :  { %73 = vmatprep.subr.mxu0 %v3485_v3  ;;  %v3518_v16 = vand.u32 4294901760, %v53_v13  ;;  %v3520_v17 = vand.u32 4294901760, %v52_v14  ;;  %v3522_v18 = vand.u32 4294901760, %v51_v15  ;;  %v3525_v19 = vsub.f32 %v59_v0, %v3485_v3  ;;  %v3530_v20 = vld [vmem:[%s4609_s1 + $0xb0] sm:$0xff]  ;;  %v3535_v21 = vld [vmem:[%s4609_s1 + $0xa8] sm:$0xff]  ;;  %v3540_v22 = vld [vmem:[%s4609_s1 + $0xa0] sm:$0xff] }
   0x5   :  { %75 = vmatpush1.msra.mxu0 %v3487_v4  ;;  %v3544_v23 = vand.u32 4294901760, %v3530_v20  ;;  %v3547_v24 = vsub.f32 %v58_v1, %v3487_v4  ;;  %v3550_v25 = vand.u32 4294901760, %v3535_v21  ;;  %v3553_v26 = vsub.f32 %v57_v2, %v3489_v5  ;;  %v3558_v27 = vld [vmem:[%s4609_s1 + $0x98] sm:$0xff]  ;;  %v3563_v28 = vld [vmem:[%s4609_s1 + $0x90] sm:$0xff]  ;;  %v3568_v29 = vld [vmem:[%s4609_s1 + $0x88] sm:$0xff] }
   0x6   :  { %77 = vmatprep.subr.mxu0 %v3489_v5  ;;  %v4628_v30 = vand.u32 4294901760, %v3525_v19  ;;  %v3573_v31 = vand.u32 4294901760, %v3540_v22  ;;  %v3576_v32 = vsub.f32 %v56_v6, %v3502_v10  ;;  %v3579_v33 = vand.u32 4294901760, %v3558_v27  ;;  %v3593_v38 = vld [vmem:[%s4609_s1 + $0x80] sm:$0xff]  ;;  %v3620_v47 = vld [vmem:[%s4609_s1 + $0x78] sm:$0xff]  ;;  %v3633_v52 = vld [vmem:[%s4609_s1 + $0x70] sm:$0xff] }
   0x7   :  { %79 = vmatpush1.msra.mxu0 %v3502_v10  ;;  %v4626_v34 = vand.u32 4294901760, %v3547_v24  ;;  %v4625_v35 = vand.u32 4294901760, %v3553_v26  ;;  %v3585_v36 = vsub.f32 %v55_v7, %v3504_v11  ;;  %v3588_v37 = vand.u32 4294901760, %v3563_v28  ;;  %v3643_v57 = vld [vmem:[%s4609_s1 + $0x68] sm:$0xff]  ;;  %v3658_v62 = vld [vmem:[%s4609_s1 + $0x60] sm:$0xff]  ;;  %v3673_v6 = vld [vmem:[%s4609_s1 + $0x58] sm:$0xff] }
   0x8   :  { %4691 = vst [vmem:[#allocation5_spill] sm:$0xff] %v3579_v33  ;;  %81 = vmatprep.subr.mxu0 %v3504_v11  ;;  %v216_v39 = vsub.f32 %v3525_v19, %v4628_v30  ;;  %v4623_v40 = vand.u32 4294901760, %v3576_v32  ;;  %v3601_v41 = vsub.f32 %v54_v8, %v3506_v12  ;;  %v3604_v42 = vand.u32 4294901760, %v3568_v29 }
   0x9   :  { %4692 = vst [vmem:[#allocation6_spill] sm:$0xff] %v3588_v37  ;;  %83 = vmatpush1.msra.mxu0 %v3506_v12  ;;  %v222_v43 = vsub.f32 %v3547_v24, %v4626_v34  ;;  %v228_v44 = vsub.f32 %v3553_v26, %v4625_v35  ;;  %v4621_v45 = vand.u32 4294901760, %v3585_v36  ;;  %v3615_v46 = vsub.f32 %v53_v13, %v3518_v16 }
   0xa   :  { %4693 = vst [vmem:[#allocation7_spill] sm:$0xff] %v3604_v42  ;;  %85 = vmatprep.subr.mxu0 %v3518_v16  ;;  %v217_v48 = vand.u32 4294901760, %v216_v39  ;;  %v234_v49 = vsub.f32 %v3576_v32, %v4623_v40  ;;  %v4620_v50 = vand.u32 4294901760, %v3601_v41  ;;  %v3628_v51 = vand.u32 4294901760, %v3593_v38 }
   0xb   :  { %87 = vmatpush1.msra.mxu0 %v3520_v17  ;;  %v223_v53 = vand.u32 4294901760, %v222_v43  ;;  %v229_v54 = vand.u32 4294901760, %v228_v44  ;;  %v240_v55 = vsub.f32 %v3585_v36, %v4621_v45  ;;  %v4618_v56 = vand.u32 4294901760, %v3615_v46 }
   0xc   :  { %4694 = vst [vmem:[#allocation8_spill] sm:$0xff] %v3628_v51  ;;  %89 = vmatprep.subr.mxu0 %v3522_v18  ;;  %218 = vmatprep.subr.mxu1 %v217_v48  ;;  %v235_v58 = vand.u32 4294901760, %v234_v49  ;;  %v246_v59 = vsub.f32 %v3601_v41, %v4620_v50  ;;  %v3650_v60 = vsub.f32 %v52_v14, %v3520_v17  ;;  %v3653_v61 = vand.u32 4294901760, %v3620_v47 }
   0xd   :  { %91 = vmatpush1.msra.mxu0 %v3544_v23  ;;  %224 = vmatpush1.msra.mxu1 %v223_v53  ;;  %v241_v63 = vand.u32 4294901760, %v240_v55  ;;  %v252_v0 = vsub.f32 %v3615_v46, %v4618_v56  ;;  %v3665_v1 = vsub.f32 %v51_v15, %v3522_v18  ;;  %v3668_v2 = vand.u32 4294901760, %v3633_v52 }
   0xe   :  { %4695 = vst [vmem:[#allocation9_spill] sm:$0xff] %v3653_v61 }
   0xf   :  { %4696 = vst [vmem:[#allocation10_spill] sm:$0xff] %v3668_v2 }
  0x10   :  { %11 = vsyncpa [#allocation3], 0  ;;  %93 = vmatprep.subr.mxu0 %v3550_v25  ;;  %230 = vmatprep.subr.mxu1 %v229_v54  ;;  %v247_v7 = vand.u32 4294901760, %v246_v59  ;;  %v4616_v8 = vand.u32 4294901760, %v3650_v60  ;;  %v3679_v13 = vsub.f32 %v3530_v20, %v3544_v23  ;;  %v3682_v14 = vand.u32 4294901760, %v3643_v57  ;;  %v3687_v15 = vld [vmem:[%s4609_s1 + $0x50] sm:$0xff] }
  0x11   :  { %95 = vmatpush1.msra.mxu0 %v3573_v31  ;;  %236 = vmatpush1.msra.mxu1 %v235_v58  ;;  %v253_v39 = vand.u32 4294901760, %v252_v0  ;;  %v4615_v43 = vand.u32 4294901760, %v3665_v1  ;;  %v3693_v44 = vsub.f32 %v3535_v21, %v3550_v25  ;;  %v3696_v20 = vand.u32 4294901760, %v3658_v62  ;;  %v3713_v21 = vld [vmem:[%s4609_s1 + $0x48] sm:$0xff]  ;;  %v3766_v45 = vld [vmem:[%s4609_s1 + $0x30] sm:$0xff]  ;;  %v3809_v30 = vld [vmem:[%s4609_s1 + $0x18] sm:$0xff] }
  0x12   :  { %4697 = vst [vmem:[#allocation11_spill] sm:$0xff] %v3682_v14  ;;  %97 = vmatprep.subr.mxu0 %v3579_v33  ;;  %242 = vmatprep.subr.mxu1 %v241_v63  ;;  %v258_v48 = vsub.f32 %v3650_v60, %v4616_v8  ;;  %v4617_v49 = vand.u32 4294901760, %v3679_v13  ;;  %v3705_v53 = vsub.f32 %v3540_v22, %v3573_v31  ;;  %v3708_v54 = vand.u32 4294901760, %v3673_v6  ;;  %v3782_v40 = vld [vmem:[%s4609_s1 + $0x28] sm:$0xff]  ;;  %s3438_s20 = smov [#allocation2]  }
  0x13   :  { %4698 = vst [vmem:[#allocation12_spill] sm:$0xff] %v3696_v20  ;;  %99 = vmatpush1.msra.mxu0 %v3588_v37  ;;  %248 = vmatpush1.msra.mxu1 %v247_v7  ;;  %v264_v55 = vsub.f32 %v3665_v1, %v4615_v43  ;;  %v4619_v58 = vand.u32 4294901760, %v3693_v44  ;;  %v3722_v22 = vsub.f32 %v3558_v27, %v3579_v33  ;;  %v3725_v59 = vand.u32 4294901760, %v3687_v15  ;;  %v3739_v27 = vld [vmem:[%s4609_s1 + $0x40] sm:$0xff]  ;;  %s3052_s21 = sshll.u32 %s3438_s20, 4  ;;  %s3053_s21 = int_to_ptr.vmem [resolvable:$true] %s3052_s21 }
  0x14   :  { %4699 = vst [vmem:[#allocation13_spill] sm:$0xff] %v3708_v54  ;;  %101 = vmatprep.subr.mxu0 %v3604_v42  ;;  %254 = vmatprep.subr.mxu1 %v253_v39  ;;  %v259_v63 = vand.u32 4294901760, %v258_v48  ;;  %v270_v0 = vsub.f32 %v3679_v13, %v4617_v49  ;;  %v4622_v7 = vand.u32 4294901760, %v3705_v53  ;;  %v3734_v43 = vsub.f32 %v3563_v28, %v3588_v37  ;;  %v3752_v28 = vld [vmem:[%s4609_s1 + $0x38] sm:$0xff]  ;;  %s3410_s23 = scalar_lea.vmem %s3053_s21, 512  ;;  %p3415_p1 = scmp.lt.s32.totalorder %s3053_s21, %s3053_s21 }
  0x15   :  { %4700 = vst [vmem:[#allocation14_spill] sm:$0xff] %v3725_v59  ;;  %103 = vmatpush1.msra.mxu0 %v3628_v51  ;;  %v265_v8 = vand.u32 4294901760, %v264_v55  ;;  %v276_v39 = vsub.f32 %v3693_v44, %v4619_v58  ;;  %v4624_v48 = vand.u32 4294901760, %v3722_v22  ;;  %v3747_v49 = vand.u32 4294901760, %v3713_v21  ;;  %p3411_p0 = scmp.ne.s32.totalorder %s3053_s21, %s3410_s23  ;;  %p3416_p2 = scmp.lt.s32.totalorder %s3410_s23, %s3410_s23 }
  0x16   :  { %260 = vmatpush1.msra.mxu1 %v259_v63  ;;  %105 = vmatprep.subr.mxu0 %v3653_v61  ;;  %v271_v56 = vand.u32 4294901760, %v270_v0  ;;  %v282_v55 = vsub.f32 %v3705_v53, %v4622_v7  ;;  %v4627_v58 = vand.u32 4294901760, %v3734_v43  ;;  %v3761_v50 = vsub.f32 %v3568_v29, %v3604_v42 }
  0x17   :  { %4701 = vst [vmem:[#allocation15_spill] sm:$0xff] %v3747_v49  ;;  %266 = vmatprep.subr.mxu1 %v265_v8  ;;  %107 = vmatpush1.msra.mxu0 %v3668_v2  ;;  %v277_v63 = vand.u32 4294901760, %v276_v39  ;;  %v288_v0 = vsub.f32 %v3722_v22, %v4624_v48  ;;  %v3773_v7 = vand.u32 4294901760, %v3739_v27  ;;  %v3777_v29 = vsub.f32 %v3593_v38, %v3628_v51  ;;  %v3795_v38 = vld [vmem:[%s4609_s1 + $0x20] sm:$0xff]  ;;  %p3417_p3 = por %p3416_p2, %p3415_p1 }
  0x18   :  { %272 = vmatpush1.msra.mxu1 %v271_v56  ;;  %109 = vmatprep.subr.mxu0 %v3682_v14  ;;  %v283_v8 = vand.u32 4294901760, %v282_v55  ;;  %v294_v39 = vsub.f32 %v3734_v43, %v4627_v58  ;;  %v4633_v48 = vand.u32 4294901760, %v3761_v50  ;;  %v3790_v35 = vand.u32 4294901760, %v3752_v28 }
  0x19   :  { %278 = vmatprep.subr.mxu1 %v277_v63  ;;  %111 = vmatpush1.msra.mxu0 %v3696_v20  ;;  %v289_v56 = vand.u32 4294901760, %v288_v0  ;;  %v4634_v55 = vand.u32 4294901760, %v3777_v29  ;;  %v3801_v34 = vsub.f32 %v3620_v47, %v3653_v61  ;;  %v3804_v58 = vand.u32 4294901760, %v3766_v45  ;;  %p3418_p4 = pnand %p3417_p3, %p3411_p0 }
  0x1a   :  { %4702 = vst [vmem:[#allocation16_spill] sm:$0xff] %v3790_v35  ;;  %284 = vmatpush1.msra.mxu1 %v283_v8  ;;  %113 = vmatprep.subr.mxu0 %v3708_v54  ;;  %v295_v63 = vand.u32 4294901760, %v294_v39  ;;  %v300_v0 = vsub.f32 %v3761_v50, %v4633_v48  ;;  %v3817_v47 = vsub.f32 %v3633_v52, %v3668_v2  ;;  %v3820_v9 = vand.u32 4294901760, %v3782_v40  ;;  %v3837_v52 = vld [vmem:[%s4609_s1 + $0x10] sm:$0xff] }
  0x1b   :  { %4703 = vst [vmem:[#allocation17_spill] sm:$0xff] %v3804_v58  ;;  %290 = vmatprep.subr.mxu1 %v289_v56  ;;  %115 = vmatpush1.msra.mxu0 %v3725_v59  ;;  %v306_v8 = vsub.f32 %v3777_v29, %v4634_v55  ;;  %v3829_v61 = vsub.f32 %v3643_v57, %v3682_v14  ;;  %v3832_v48 = vand.u32 4294901760, %v3795_v38  ;;  %v3846_v57 = vand.u32 4294901760, %v3809_v30  ;;  %v3851_v14 = vld [vmem:[%s4609_s1 + $0x8] sm:$0xff] }
  0x1c   :  { %4704 = vst [vmem:[#allocation18_spill] sm:$0xff] %v3820_v9  ;;  %296 = vmatpush1.msra.mxu1 %v295_v63  ;;  %117 = vmatprep.subr.mxu0 %v3747_v49  ;;  %v301_v56 = vand.u32 4294901760, %v300_v0  ;;  %v3843_v39 = vsub.f32 %v3658_v62, %v3696_v20  ;;  %v4706_v2 = vand.u32 4294901760, %v3801_v34  ;;  %v3860_v62 = vsub.f32 %v3673_v6, %v3708_v54  ;;  %v3877_v6 = vld [vmem:[%s4609_s1] sm:$0xff] }
  0x1d   :  { %4705 = vst [vmem:[#allocation19_spill] sm:$0xff] %v3832_v48  ;;  %119 = vmatpush1.msra.mxu0 %v3773_v7  ;;  %v307_v63 = vand.u32 4294901760, %v306_v8  ;;  %v4651_v55 = vand.u32 4294901760, %v3829_v61  ;;  %v4708_v20 = vand.u32 4294901760, %v3817_v47  ;;  %v3868_v8 = vand.u32 4294901760, %v3837_v52 }
  0x1e   :  { %v312_v0 = vsub.f32 %v3801_v34, %v4706_v2  ;;  %4707 = vst [vmem:[#allocation20_spill] sm:$0xff] %v3860_v62  ;;  %302 = vmatprep.subr.mxu1 %v301_v56  ;;  %121 = vmatprep.subr.mxu0 %v3790_v35  ;;  %v3872_v2 = vsub.f32 %v3687_v15, %v3725_v59  ;;  %v3885_v54 = vand.u32 4294901760, %v3851_v14  ;;  %v4710_v59 = vand.u32 4294901760, %v3843_v39 }
  0x1f   :  { %v318_v51 = vsub.f32 %v3817_v47, %v4708_v20  ;;  %308 = vmatpush1.msra.mxu1 %v307_v63  ;;  %123 = vmatpush1.msra.mxu0 %v3804_v58  ;;  %v324_v20 = vsub.f32 %v3829_v61, %v4651_v55  ;;  %v24_v55 = vld [vmem:[%s4608_s0] sm:$0xff]  ;;  %v3908_v63 = vsub.f32 %v3739_v27, %v3773_v7  ;;  %vm1153_vm0 = vcmask 523264  }
  0x20   :  { %v313_v56 = vand.u32 4294901760, %v312_v0  ;;  %4709 = vst [vmem:[#allocation21_spill] sm:$0xff] %v3885_v54  ;;  %125 = vmatprep.subr.mxu0 %v3820_v9  ;;  %v330_v37 = vsub.f32 %v3843_v39, %v4710_v59  ;;  %v3894_v0 = vsub.f32 %v3713_v21, %v3747_v49  ;;  %v3904_v59 = vand.u32 4294901760, %v3877_v6 }
  0x21   :  { %v319_v15 = vand.u32 4294901760, %v318_v51  ;;  %v325_v42 = vand.u32 4294901760, %v324_v20  ;;  %127 = vmatpush1.msra.mxu0 %v3832_v48  ;;  %v4712_v51 = vand.u32 4294901760, %v3860_v62  ;;  %v4661_v27 = vand.u32 4294901760, %v3908_v63 }
  0x22   :  { %4711 = vst [vmem:[#allocation22_spill] sm:$0xff] %v3894_v0  ;;  %314 = vmatprep.subr.mxu1 %v313_v56  ;;  %4713 = vst [vmem:[#allocation23_spill] sm:$0xff] %v3904_v59  ;;  %v331_v21 = vand.u32 4294901760, %v330_v37  ;;  %129 = vmatprep.subr.mxu0 %v3846_v57  ;;  %v4714_v56 = vand.u32 4294901760, %v3872_v2  ;;  %v4658_v49 = vand.u32 4294901760, %v3894_v0  ;;  %v3925_v37 = vsub.f32 %v3766_v45, %v3804_v58 }
  0x23   :  { %v336_v33 = vsub.f32 %v3860_v62, %v4712_v51  ;;  %320 = vmatpush1.msra.mxu1 %v319_v15  ;;  %v3917_v51 = vsub.f32 %v3752_v28, %v3790_v35  ;;  %131 = vmatpush1.msra.mxu0 %v3868_v8  ;;  %v3921_v15 = vand.u32 4294901760, %v24_v55  ;;  %v354_v45 = vsub.f32 %v3908_v63, %v4661_v27 }
  0x24   :  { %v342_v20 = vsub.f32 %v3872_v2, %v4714_v56  ;;  %326 = vmatprep.subr.mxu1 %v325_v42  ;;  %4716 = vst [vmem:[#allocation25_spill] sm:$0xff] %v3925_v37  ;;  %133 = vmatprep.subr.mxu0 %v3885_v54  ;;  %v348_v28 = vsub.f32 %v3894_v0, %v4658_v49  ;;  %vm1139_vm1 = vcmask 1040384   ;;  %vm1141_vm2 = vcmask 1041408  }
  0x25   :  { %v337_v62 = vand.u32 4294901760, %v336_v33  ;;  %4715 = vst [vmem:[#allocation24_spill] sm:$0xff] %v3921_v15  ;;  %332 = vmatpush1.msra.mxu1 %v331_v21  ;;  %v3934_v42 = vsub.f32 %v3782_v40, %v3820_v9  ;;  %135 = vmatpush1.msra.mxu0 %v3904_v59  ;;  %v3941_v21 = vsub.f32 %v24_v55, %v3921_v15  ;;  %v4717_v40 = vand.u32 4294901760, %v3917_v51 }
  0x26   :  { %v343_v56 = vand.u32 4294901760, %v342_v20  ;;  %v3946_v49 = vsub.f32 %v3795_v38, %v3832_v48  ;;  %v349_v33 = vand.u32 4294901760, %v348_v28  ;;  %468 = vmatprep.subr.mxu0 %v3525_v19  ;;  %v3955_v55 = vsub.f32 %v3809_v30, %v3846_v57 }
  0x27   :  { %338 = vmatprep.subr.mxu1 %v337_v62  ;;  %v360_v62 = vsub.f32 %v3917_v51, %v4717_v40  ;;  %v4666_v9 = vand.u32 4294901760, %v3934_v42  ;;  %v355_v27 = vand.u32 4294901760, %v354_v45  ;;  %v4667_v20 = vand.u32 4294901760, %v3941_v21 }
  0x28   :  { %344 = vmatpush1.msra.mxu1 %v343_v56  ;;  %v4718_v38 = vand.u32 4294901760, %v3925_v37  ;;  %v4668_v28 = vand.u32 4294901760, %v3946_v49  ;;  %v4669_v58 = vand.u32 4294901760, %v3955_v55  ;;  %v3968_v30 = vsub.f32 %v3837_v52, %v3868_v8 }
  0x29   :  { %350 = vmatprep.subr.mxu1 %v349_v33  ;;  %v361_v48 = vand.u32 4294901760, %v360_v62  ;;  %v372_v40 = vsub.f32 %v3934_v42, %v4666_v9  ;;  %v172_v45 = vsub.f32 %v3941_v21, %v4667_v20  ;;  %v3978_v62 = vsub.f32 %v3851_v14, %v3885_v54 }
  0x2a   :  { %v366_v56 = vsub.f32 %v3925_v37, %v4718_v38  ;;  %356 = vmatpush1.msra.mxu1 %v355_v27  ;;  %v378_v33 = vsub.f32 %v3946_v49, %v4668_v28  ;;  %v384_v52 = vsub.f32 %v3955_v55, %v4669_v58  ;;  %v4676_v27 = vand.u32 4294901760, %v3968_v30 }
  0x2b   :  { %4719 = vst [vmem:[#allocation26_spill] sm:$0xff] %v3978_v62  ;;  %362 = vmatprep.subr.mxu1 %v361_v48  ;;  %v373_v9 = vand.u32 4294901760, %v372_v40  ;;  %v3986_v20 = vsub.f32 %v3877_v6, %v3904_v59  ;;  %v173_v28 = vand.u32 4294901760, %v172_v45  ;;  %v4675_v48 = vand.u32 4294901760, %v3978_v62 }
  0x2c   :  { %v367_v38 = vand.u32 4294901760, %v366_v56  ;;  %v25_v56 = vld [vmem:[%s4608_s0 + $0x8] sm:$0xff]  ;;  %v379_v14 = vand.u32 4294901760, %v378_v33  ;;  %v385_v40 = vand.u32 4294901760, %v384_v52  ;;  %v390_v58 = vsub.f32 %v3968_v30, %v4676_v27 }
  0x2d   :  { %4720 = vst [vmem:[#allocation27_spill] sm:$0xff] %v3986_v20  ;;  %v4674_v54 = vand.u32 4294901760, %v3986_v20  ;;  %174 = vmatmul.mubr.f32.vlgmr.msra.gmra.mxu0 %v173_v28  ;;  %v396_v6 = vsub.f32 %v3978_v62, %v4675_v48  ;;  %v3999_v59 = vand.u32 4294901760, %v25_v56  ;;  %v4722_v33 = vmov 0.0   ;;  %v4724_v48 = vld [vmem:[#allocation5_spill] sm:$0xff] }
  0x2e   :  { %368 = vmatpush1.msra.mxu1 %v367_v38  ;;  %471 = vmatpush1.msra.mxu0 %v3547_v24  ;;  %v391_v45 = vand.u32 4294901760, %v390_v58  ;;  %v26_v38 = vld [vmem:[%s4608_s0 + $0x10] sm:$0xff]  ;;  %vm1143_vm3 = vcmask 1042432   ;;  %vm1145_vm4 = vcmask 1043456   ;;  %vm1147_vm5 = vcmask 1044480  }
  0x2f   :  { %374 = vmatprep.subr.mxu1 %v373_v9  ;;  %4721 = vst [vmem:[#allocation28_spill] sm:$0xff] %v3999_v59  ;;  %v402_v9 = vsub.f32 %v3986_v20, %v4674_v54  ;;  %474 = vmatprep.subr.mxu0 %v3553_v26  ;;  %v397_v28 = vand.u32 4294901760, %v396_v6  ;;  %v4013_v58 = vsub.f32 %v25_v56, %v3999_v59  ;;  %vm1149_vm6 = vcmask 1045504  }
  0x30   :  { %380 = vmatpush1.msra.mxu1 %v379_v14  ;;  %179 = vmatprep.mubr.f32.mxu0 %v4722_v33  ;;  %v4015_v14 = vand.u32 4294901760, %v26_v38  ;;  %vm1151_vm7 = vcmask 1046528   ;;  %vm1652_vm8 = vcmask 31744  }
  0x31   :  { %386 = vmatprep.subr.mxu1 %v385_v40  ;;  %477 = vmatpush1.msra.mxu0 %v3576_v32  ;;  %v403_v52 = vand.u32 4294901760, %v402_v9  ;;  %v27_v40 = vld [vmem:[%s4608_s0 + $0x18] sm:$0xff]  ;;  %v4678_v56 = vand.u32 4294901760, %v4013_v58 }
  0x32   :  { %392 = vmatpush1.msra.mxu1 %v391_v45  ;;  %480 = vmatprep.subr.mxu0 %v3585_v36  ;;  %4723 = vst [vmem:[#allocation29_spill] sm:$0xff] %v4015_v14  ;;  %v4029_v6 = vsub.f32 %v26_v38, %v4015_v14  ;;  %v4035_v45 = vand.u32 4294901760, %v27_v40 }
  0x33   :  { %398 = vmatprep.subr.mxu1 %v397_v28  ;;  %483 = vmatpush1.msra.mxu0 %v3601_v41  ;;  %v183_v9 = vsub.f32 %v4013_v58, %v4678_v56  ;;  %v4727_v56 = vld [vmem:[#allocation7_spill] sm:$0xff] }
  0x34   :  { %404 = vmatpush1.msra.mxu1 %v403_v52  ;;  %486 = vmatprep.subr.mxu0 %v3615_v46  ;;  %v4677_v38 = vand.u32 4294901760, %v4029_v6  ;;  %v4050_v28 = vsub.f32 %v27_v40, %v4035_v45 }
  0x35   :  { %439 = vmatmul.mubr.f32.vlgmr.msra.gmra.mxu1 %v3921_v15  ;;  %489 = vmatpush1.msra.mxu0 %v3650_v60  ;;  %v184_v52 = vand.u32 4294901760, %v183_v9  ;;  %v4725_v9 = vld [vmem:[#allocation20_spill] sm:$0xff] }
  0x36   :  { %628 = vmatprep.subr.mxu1 %v3485_v3  ;;  %492 = vmatprep.subr.mxu0 %v3665_v1  ;;  %v194_v54 = vsub.f32 %v4029_v6, %v4677_v38  ;;  %v4682_v40 = vand.u32 4294901760, %v4050_v28  ;;  %v4726_v38 = vld [vmem:[#allocation6_spill] sm:$0xff] }
  0x37   :  { %630 = vmatpush1.msra.mxu1 %v3487_v4  ;;  %495 = vmatpush1.msra.mxu0 %v3679_v13 }
  0x38   :  { %632 = vmatprep.subr.mxu1 %v3489_v5  ;;  %498 = vmatprep.subr.mxu0 %v3693_v44  ;;  %v195_v27 = vand.u32 4294901760, %v194_v54  ;;  %v205_v15 = vsub.f32 %v4050_v28, %v4682_v40  ;;  %v4729_v54 = vld [vmem:[#allocation9_spill] sm:$0xff]  ;;  %v4731_v40 = vld [vmem:[#allocation11_spill] sm:$0xff] }
  0x39   :  { %634 = vmatpush1.msra.mxu1 %v3502_v10  ;;  %501 = vmatpush1.msra.mxu0 %v3705_v53 }
  0x3a   :  { %636 = vmatprep.subr.mxu1 %v3504_v11  ;;  %504 = vmatprep.subr.mxu0 %v3722_v22 }
  0x3b   :  { %638 = vmatpush1.msra.mxu1 %v3506_v12  ;;  %507 = vmatpush1.msra.mxu0 %v3734_v43 }
  0x3c   :  { %640 = vmatprep.subr.mxu1 %v3518_v16  ;;  %510 = vmatprep.subr.mxu0 %v3761_v50 }
  0x3d   :  { %642 = vmatpush1.msra.mxu1 %v3520_v17  ;;  %513 = vmatpush1.msra.mxu0 %v3777_v29 }
  0x3e   :  { %644 = vmatprep.subr.mxu1 %v3522_v18  ;;  %516 = vmatprep.subr.mxu0 %v3801_v34 }
  0x3f   :  { %646 = vmatpush1.msra.mxu1 %v3544_v23  ;;  %519 = vmatpush1.msra.mxu0 %v3817_v47 }
  0x40   :  { %648 = vmatprep.subr.mxu1 %v3550_v25  ;;  %522 = vmatprep.subr.mxu0 %v3829_v61 }
  0x41   :  { %650 = vmatpush1.msra.mxu1 %v3573_v31  ;;  %525 = vmatpush1.msra.mxu0 %v3843_v39 }
  0x42   :  { %652 = vmatprep.subr.mxu1 %v4724_v48  ;;  %185 = vmatmul.mubr.f32.gmra.mxu0 %v184_v52  ;;  %v4728_v52 = vld [vmem:[#allocation8_spill] sm:$0xff] }
  0x43   :  { %528 = vmatprep.subr.mxu0 %v4725_v9  ;;  %654 = vmatpush1.msra.mxu1 %v4726_v38 }
  0x44   :  { %531 = vmatpush1.msra.mxu0 %v3872_v2  ;;  %656 = vmatprep.subr.mxu1 %v4727_v56  ;;  %v206_v56 = vand.u32 4294901760, %v205_v15  ;;  %v4734_v15 = vld [vmem:[#allocation14_spill] sm:$0xff] }
  0x45   :  { %534 = vmatprep.subr.mxu0 %v3894_v0  ;;  %190 = vmatprep.mubr.f32.mxu0 %v4722_v33  ;;  %v4730_v0 = vld [vmem:[#allocation10_spill] sm:$0xff] }
  0x46   :  { %537 = vmatpush1.msra.mxu0 %v3908_v63  ;;  %658 = vmatpush1.msra.mxu1 %v4728_v52 }
  0x47   :  { %196 = vmatmul.mubr.f32.gmra.mxu0 %v195_v27  ;;  %540 = vmatprep.subr.mxu0 %v3917_v51  ;;  %v4732_v27 = vld [vmem:[#allocation12_spill] sm:$0xff] }
  0x48   :  { %660 = vmatprep.subr.mxu1 %v4729_v54  ;;  %543 = vmatpush1.msra.mxu0 %v3925_v37  ;;  %v4733_v37 = vld [vmem:[#allocation13_spill] sm:$0xff] }
  0x49   :  { %662 = vmatpush1.msra.mxu1 %v4730_v0  ;;  %444 = vmatprep.mubr.f32.mxu1 %v4722_v33 }
  0x4a   :  { %546 = vmatprep.subr.mxu0 %v3934_v42  ;;  %664 = vmatprep.subr.mxu1 %v4731_v40  ;;  %v4735_v40 = vld [vmem:[#allocation15_spill] sm:$0xff] }
  0x4b   :  { %201 = vmatprep.mubr.f32.mxu0 %v4722_v33  ;;  %446 = vmatmul.mubr.f32.gmra.mxu1 %v3999_v59  ;;  %v4737_v59 = vld [vmem:[#allocation17_spill] sm:$0xff] }
  0x4c   :  { %549 = vmatpush1.msra.mxu0 %v3946_v49  ;;  %666 = vmatpush1.msra.mxu1 %v4732_v27 }
  0x4d   :  { %207 = vmatmul.mubr.f32.gmra.mxu0 %v206_v56  ;;  %552 = vmatprep.subr.mxu0 %v3955_v55  ;;  %v4736_v56 = vand.u32 4294901760, %v3525_v19  ;;  %v4742_v19 = vand.u32 4294901760, %v3576_v32  ;;  %v4747_v32 = vld [vmem:[#allocation23_spill] sm:$0xff] }
  0x4e   :  { %668 = vmatprep.subr.mxu1 %v4733_v37  ;;  %555 = vmatpush1.msra.mxu0 %v3968_v30 }
  0x4f   :  { %670 = vmatpush1.msra.mxu1 %v4734_v15  ;;  %451 = vmatprep.mubr.f32.mxu1 %v4722_v33 }
  0x50   :  { %558 = vmatprep.subr.mxu0 %v3978_v62  ;;  %672 = vmatprep.subr.mxu1 %v4735_v40  ;;  %v4738_v62 = vand.u32 4294901760, %v3547_v24  ;;  %v4743_v24 = vand.u32 4294901760, %v3585_v36  ;;  %v4749_v36 = vand.u32 4294901760, %v3941_v21 }
  0x51   :  { %453 = vmatmul.mubr.f32.gmra.mxu1 %v4015_v14  ;;  %561 = vmatpush1.msra.mxu0 %v3986_v20  ;;  %v4739_v14 = vld [vmem:[#allocation18_spill] sm:$0xff]  ;;  %v4740_v20 = vand.u32 4294901760, %v3553_v26  ;;  %v4744_v26 = vand.u32 4294901760, %v3601_v41  ;;  %v4750_v41 = vand.u32 4294901760, %v3665_v1  ;;  %v4757_v1 = vand.u32 4294901760, %v3761_v50 }
  0x52   :  { %594 = vmatprep.mubr.f32.mxu0 %v4722_v33  ;;  %674 = vmatpush1.msra.mxu1 %v3773_v7 }
  0x53   :  { %597 = vmatmul.mubr.f32.vlgmr.msra.gmra.mxu0 %v3941_v21  ;;  %676 = vmatprep.subr.mxu1 %v3790_v35  ;;  %v4741_v35 = vld [vmem:[#allocation19_spill] sm:$0xff]  ;;  %v4785_v21 = vld [vmem:[#allocation28_spill] sm:$0xff] }
  0x54   :  { %763 = vmatprep.subr.mxu0 %v4736_v56  ;;  %678 = vmatpush1.msra.mxu1 %v4737_v59  ;;  %v4748_v56 = vand.u32 4294901760, %v3650_v60  ;;  %v4753_v60 = vand.u32 4294901760, %v3705_v53 }
  0x55   :  { %767 = vmatpush1.msra.mxu0 %v4738_v62  ;;  %458 = vmatprep.mubr.f32.mxu1 %v4722_v33  ;;  %v4746_v62 = vand.u32 4294901760, %v3615_v46  ;;  %v4751_v46 = vand.u32 4294901760, %v3679_v13  ;;  %v4759_v13 = vand.u32 4294901760, %v3801_v34  ;;  %v4764_v34 = vand.u32 4294901760, %v4725_v9 }
  0x56   :  { %680 = vmatprep.subr.mxu1 %v4739_v14  ;;  %771 = vmatprep.subr.mxu0 %v4740_v20  ;;  %v4745_v20 = vld [vmem:[#allocation21_spill] sm:$0xff] }
  0x57   :  { %460 = vmatmul.mubr.f32.gmra.mxu1 %v4035_v45  ;;  %602 = vmatprep.mubr.f32.mxu0 %v4722_v33 }
  0x58   :  { %682 = vmatpush1.msra.mxu1 %v4741_v35  ;;  %775 = vmatpush1.msra.mxu0 %v4742_v19  ;;  %v4752_v19 = vand.u32 4294901760, %v3693_v44  ;;  %v4772_v44 = vld [vmem:[#allocation25_spill] sm:$0xff] }
  0x59   :  { %684 = vmatprep.subr.mxu1 %v3846_v57  ;;  %605 = vmatmul.mubr.f32.gmra.mxu0 %v4013_v58  ;;  %v4773_v53 = vand.u32 4294901760, %v4772_v44 }
  0x5a   :  { %779 = vmatprep.subr.mxu0 %v4743_v24  ;;  %686 = vmatpush1.msra.mxu1 %v3868_v8  ;;  %v62_v24 = vlaneseq }
  0x5b   :  { %783 = vmatpush1.msra.mxu0 %v4744_v26  ;;  %688 = vmatprep.subr.mxu1 %v4745_v20 }
  0x5c   :  { %787 = vmatprep.subr.mxu0 %v4746_v62  ;;  %610 = vmatprep.mubr.f32.mxu0 %v4722_v33  ;;  %v4250_v62 = vshrl.u32 %v62_v24, 7 }
  0x5d   :  { %690 = vmatpush1.msra.mxu1 %v4747_v32  ;;  %723 = vmatprep.mubr.f32.mxu1 %v4722_v33 }
  0x5e   :  { %791 = vmatpush1.msra.mxu0 %v4748_v56  ;;  %727 = vmatmul.mubr.f32.vlgmr.msra.gmra.mxu1 %v4749_v36  ;;  %v64_v36 = vsub.s32 0, %v4250_v62 }
  0x5f   :  { %613 = vmatmul.mubr.f32.gmra.mxu0 %v4029_v6  ;;  %795 = vmatprep.subr.mxu0 %v4750_v41 }
  0x60   :  { %950 = vmatprep.subr.mxu1 %v3485_v3  ;;  %799 = vmatpush1.msra.mxu0 %v4751_v46  ;;  %v4754_v3 = vand.u32 4294901760, %v4013_v58  ;;  %v60_v46 = vld [vmem:[%s4610_s2] sm:$0x3] }
  0x61   :  { %952 = vmatpush1.msra.mxu1 %v3487_v4  ;;  %803 = vmatprep.subr.mxu0 %v4752_v19  ;;  %v4755_v4 = vand.u32 4294901760, %v3722_v22  ;;  %v4774_v22 = vand.u32 4294901760, %v3934_v42  ;;  %v4783_v42 = vld [vmem:[#allocation24_spill] sm:$0xff] }
  0x62   :  { %954 = vmatprep.subr.mxu1 %v3489_v5  ;;  %618 = vmatprep.mubr.f32.mxu0 %v4722_v33  ;;  %v4756_v5 = vand.u32 4294901760, %v3734_v43  ;;  %v4771_v43 = vand.u32 4294901760, %v3917_v51  ;;  %v4781_v51 = vld [vmem:[#allocation27_spill] sm:$0xff] }
  0x63   :  { %732 = vmatprep.mubr.f32.mxu1 %v4722_v33  ;;  %807 = vmatpush1.msra.mxu0 %v4753_v60  ;;  %v68_v60 = vsub.s32 1, %v4250_v62 }
  0x64   :  { %956 = vmatpush1.msra.mxu1 %v3502_v10  ;;  %621 = vmatmul.mubr.f32.gmra.mxu0 %v4050_v28  ;;  %v4758_v10 = vand.u32 4294901760, %v3777_v29  ;;  %v4775_v29 = vld [vmem:[#allocation11_spill] sm:$0xff] }
  0x65   :  { %736 = vmatmul.mubr.f32.gmra.mxu1 %v4754_v3  ;;  %811 = vmatprep.subr.mxu0 %v4755_v4  ;;  %v65_v3 = vrot.slane %v60_v46, %v64_v36 }
  0x66   :  { %958 = vmatprep.subr.mxu1 %v3504_v11  ;;  %815 = vmatpush1.msra.mxu0 %v4756_v5  ;;  %v4760_v11 = vand.u32 4294901760, %v4029_v6 }
  0x67   :  { %960 = vmatpush1.msra.mxu1 %v3506_v12  ;;  %819 = vmatprep.subr.mxu0 %v4757_v1  ;;  %v4761_v12 = vand.u32 4294901760, %v3817_v47  ;;  %v4776_v47 = vand.u32 4294901760, %v3946_v49  ;;  %v4782_v49 = vand.u32 4294901760, %v4781_v51  ;;  %v69_v1 = vrot.slane %v60_v46, %v68_v60 }
  0x68   :  { %962 = vmatprep.subr.mxu1 %v3518_v16  ;;  %741 = vmatprep.mubr.f32.mxu1 %v4722_v33  ;;  %v4762_v16 = vand.u32 4294901760, %v3829_v61  ;;  %v4769_v61 = vld [vmem:[#allocation7_spill] sm:$0xff] }
  0x69   :  { %823 = vmatpush1.msra.mxu0 %v4758_v10  ;;  %964 = vmatpush1.msra.mxu1 %v3520_v17  ;;  %v4763_v17 = vand.u32 4294901760, %v3843_v39  ;;  %v4777_v39 = vand.u32 4294901760, %v3955_v55 }
  0x6a   :  { %827 = vmatprep.subr.mxu0 %v4759_v13  ;;  %745 = vmatmul.mubr.f32.gmra.mxu1 %v4760_v11 }
  0x6b   :  { %966 = vmatprep.subr.mxu1 %v3522_v18  ;;  %831 = vmatpush1.msra.mxu0 %v4761_v12  ;;  %v4765_v18 = vand.u32 4294901760, %v4050_v28 }
  0x6c   :  { %968 = vmatpush1.msra.mxu1 %v3544_v23  ;;  %835 = vmatprep.subr.mxu0 %v4762_v16  ;;  %v4766_v23 = vand.u32 4294901760, %v3872_v2  ;;  %v4778_v2 = vand.u32 4294901760, %v3968_v30 }
  0x6d   :  { %970 = vmatprep.subr.mxu1 %v3550_v25  ;;  %750 = vmatprep.mubr.f32.mxu1 %v4722_v33  ;;  %v4767_v25 = vld [vmem:[#allocation22_spill] sm:$0xff] }
  0x6e   :  { %839 = vmatpush1.msra.mxu0 %v4763_v17  ;;  %972 = vmatpush1.msra.mxu1 %v3573_v31  ;;  %v4768_v50 = vand.u32 4294901760, %v4767_v25  ;;  %v4770_v31 = vand.u32 4294901760, %v3908_v63  ;;  %v4779_v63 = vld [vmem:[#allocation26_spill] sm:$0xff] }
  0x6f   :  { %843 = vmatprep.subr.mxu0 %v4764_v34  ;;  %754 = vmatmul.mubr.f32.gmra.mxu1 %v4765_v18 }
  0x70   :  { %974 = vmatprep.subr.mxu1 %v4724_v48  ;;  %847 = vmatpush1.msra.mxu0 %v4766_v23 }
  0x71   :  { %976 = vmatpush1.msra.mxu1 %v4726_v38  ;;  %851 = vmatprep.subr.mxu0 %v4768_v50 }
  0x72   :  { %978 = vmatprep.subr.mxu1 %v4769_v61  ;;  %855 = vmatpush1.msra.mxu0 %v4770_v31 }
  0x73   :  { %980 = vmatpush1.msra.mxu1 %v4728_v52  ;;  %859 = vmatprep.subr.mxu0 %v4771_v43 }
  0x74   :  { %982 = vmatprep.subr.mxu1 %v4729_v54  ;;  %863 = vmatpush1.msra.mxu0 %v4773_v53 }
  0x75   :  { %984 = vmatpush1.msra.mxu1 %v4730_v0  ;;  %867 = vmatprep.subr.mxu0 %v4774_v22  ;;  %v4780_v0 = vand.u32 4294901760, %v4779_v63 }
  0x76   :  { %986 = vmatprep.subr.mxu1 %v4775_v29  ;;  %871 = vmatpush1.msra.mxu0 %v4776_v47 }
  0x77   :  { %988 = vmatpush1.msra.mxu1 %v4732_v27  ;;  %875 = vmatprep.subr.mxu0 %v4777_v39 }
  0x78   :  { %990 = vmatprep.subr.mxu1 %v4733_v37  ;;  %879 = vmatpush1.msra.mxu0 %v4778_v2  ;;  %v4784_v37 = vld [vmem:[#allocation16_spill] sm:$0xff] }
  0x79   :  { %992 = vmatpush1.msra.mxu1 %v4734_v15  ;;  %883 = vmatprep.subr.mxu0 %v4780_v0 }
  0x7a   :  { %994 = vmatprep.subr.mxu1 %v4735_v40  ;;  %887 = vmatpush1.msra.mxu0 %v4782_v49 }
  0x7b   :  { %920 = vmatprep.mubr.f32.mxu0 %v4722_v33  ;;  %996 = vmatpush1.msra.mxu1 %v3773_v7  ;;  %v4786_v7 = vld [vmem:[#allocation29_spill] sm:$0xff] }
  0x7c   :  { %922 = vmatmul.mubr.f32.vlgmr.msra.gmra.mxu0 %v4783_v42  ;;  %998 = vmatprep.subr.mxu1 %v4784_v37 }
  0x7d   :  { %927 = vmatprep.mubr.f32.mxu0 %v4722_v33  ;;  %1000 = vmatpush1.msra.mxu1 %v4737_v59 }
  0x7e   :  { %1045 = vmatprep.mubr.f32.mxu1 %v4722_v33  ;;  %1002 = vmatprep.subr.mxu1 %v4739_v14 }
  0x7f   :  { %1004 = vmatpush1.msra.mxu1 %v4741_v35 }
  0x80   :  { %929 = vmatmul.mubr.f32.gmra.mxu0 %v4785_v21  ;;  %1006 = vmatprep.subr.mxu1 %v3846_v57 }
  0x81   :  { %934 = vmatprep.mubr.f32.mxu0 %v4722_v33  ;;  %1008 = vmatpush1.msra.mxu1 %v3868_v8 }
  0x82   :  { %1010 = vmatprep.subr.mxu1 %v4745_v20 }
  0x83   :  { %1012 = vmatpush1.msra.mxu1 %v4747_v32 }
  0x84   :  { %936 = vmatmul.mubr.f32.gmra.mxu0 %v4786_v7  ;;  %1047 = vmatmul.mubr.f32.vlgmr.msra.gmra.mxu1 %v4783_v42 }
  0x85   :  { %941 = vmatprep.mubr.f32.mxu0 %v4722_v33  ;;  %1052 = vmatprep.mubr.f32.mxu1 %v4722_v33 }
  0x88   :  { %943 = vmatmul.mubr.f32.gmra.mxu0 %v4035_v45  ;;  %1054 = vmatmul.mubr.f32.gmra.mxu1 %v4785_v21 }
  0x89   :  { %1059 = vmatprep.mubr.f32.mxu1 %v4722_v33 }
  0x8c   :  { %1061 = vmatmul.mubr.f32.gmra.mxu1 %v4786_v7 }
  0x8d   :  { %1066 = vmatprep.mubr.f32.mxu1 %v4722_v33 }
  0x90   :  { %1068 = vmatmul.mubr.f32.gmra.mxu1 %v4035_v45 }
  0xed   :  { %v175_v35 = vpop.f32.mrf.mxu0 }
  0xee   :  { %v176_v10 = vadd.f32 %v175_v35, %v65_v3 }
  0xef   :  { %v177_v57 = vpop.f32.mrf.mxu0 }
  0xf0   :  { %v178_v12 = vadd.f32 %v177_v57, %v69_v1 }
  0xf5   :  { %v440_v59 = vpop.f32.mrf.mxu1 }
  0xf6   :  { %v441_v17 = vadd.f32 %v440_v59, %v176_v10 }
  0xf7   :  { %v442_v30 = vpop.f32.mrf.mxu1 }
  0xf8   :  { %v443_v25 = vadd.f32 %v442_v30, %v178_v12 }
 0x102   :  { %v186_v8 = vpop.f32.mrf.mxu0 }
 0x103   :  { %v187_v34 = vadd.f32 %v186_v8, %v65_v3 }
 0x104   :  { %v188_v55 = vpop.f32.mrf.mxu0 }
 0x105   :  { %v189_v31 = vadd.f32 %v188_v55, %v69_v1 }
 0x107   :  { %v197_v48 = vpop.f32.mrf.mxu0 }
 0x108   :  { %v198_v43 = vadd.f32 %v197_v48, %v65_v3 }
 0x109   :  { %v4240_v14 = vpop.f32.mrf.mxu0 }
 0x10b   :  { %v447_v58 = vpop.f32.mrf.mxu1 }
 0x10c   :  { %v448_v44 = vadd.f32 %v447_v58, %v187_v34 }
 0x10d   :  { %v449_v6 = vpop.f32.mrf.mxu1  ;;  %v208_v38 = vpop.f32.mrf.mxu0 }
 0x10e   :  { %v450_v0 = vadd.f32 %v449_v6, %v189_v31  ;;  %v209_v35 = vadd.f32 %v208_v38, %v65_v3  ;;  %v200_v38 = vadd.f32 %v4240_v14, %v69_v1 }
 0x10f   :  { %v4242_v40 = vpop.f32.mrf.mxu0 }
 0x111   :  { %v454_v28 = vpop.f32.mrf.mxu1 }
 0x112   :  { %v455_v49 = vadd.f32 %v454_v28, %v198_v43 }
 0x113   :  { %v4244_v9 = vpop.f32.mrf.mxu1  ;;  %v598_v33 = vpop.f32.mrf.mxu0 }
 0x114   :  { %v599_v50 = vadd.f32 %v598_v33, %v441_v17 }
 0x115   :  { %v600_v45 = vpop.f32.mrf.mxu0 }
 0x116   :  { %v601_v53 = vadd.f32 %v600_v45, %v443_v25 }
 0x117   :  { %v4246_v52 = vpop.f32.mrf.mxu1 }
 0x118   :  { %v462_v24 = vadd.f32 %v4246_v52, %v209_v35 }
 0x119   :  { %v4248_v54 = vpop.f32.mrf.mxu1  ;;  %v606_v27 = vpop.f32.mrf.mxu0 }
 0x11a   :  { %v607_v39 = vadd.f32 %v606_v27, %v448_v44 }
 0x11b   :  { %v608_v26 = vpop.f32.mrf.mxu0 }
 0x11c   :  { %v609_v57 = vadd.f32 %v608_v26, %v450_v0 }
 0x11e   :  { %v728_v15 = vpop.f32.mrf.mxu1 }
 0x11f   :  { %v614_v32 = vpop.f32.mrf.mxu0  ;;  %v729_v22 = vadd.f32 %v728_v15, %v599_v50  ;;  %v457_v50 = vadd.f32 %v4244_v9, %v200_v38 }
 0x120   :  { %v730_v20 = vpop.f32.mrf.mxu1  ;;  %v615_v59 = vadd.f32 %v614_v32, %v455_v49 }
 0x121   :  { %v4253_v41 = vpop.f32.mrf.mxu0  ;;  %v731_v2 = vadd.f32 %v730_v20, %v601_v53 }
 0x124   :  { %v622_v4 = vpop.f32.mrf.mxu0 }
 0x125   :  { %v737_v56 = vpop.f32.mrf.mxu1  ;;  %v623_v10 = vadd.f32 %v622_v4, %v462_v24 }
 0x126   :  { %v4263_v13 = vpop.f32.mrf.mxu0  ;;  %v738_v42 = vadd.f32 %v737_v56, %v607_v39 }
 0x127   :  { %v739_v19 = vpop.f32.mrf.mxu1 }
 0x128   :  { %v740_v58 = vadd.f32 %v739_v19, %v609_v57 }
 0x12a   :  { %v746_v5 = vpop.f32.mrf.mxu1 }
 0x12b   :  { %v747_v45 = vadd.f32 %v746_v5, %v615_v59  ;;  %v211_v5 = vadd.f32 %v4242_v40, %v69_v1 }
 0x12c   :  { %v4265_v11 = vpop.f32.mrf.mxu1 }
 0x12f   :  { %v755_v23 = vpop.f32.mrf.mxu1 }
 0x131   :  { %v4267_v47 = vpop.f32.mrf.mxu1 }
 0x13c   :  { %v923_v16 = vpop.f32.mrf.mxu0 }
 0x13d   :  { %v924_v63 = vadd.f32 %v923_v16, %v729_v22  ;;  %v464_v22 = vadd.f32 %v4248_v54, %v211_v5 }
 0x13e   :  { %v925_v18 = vpop.f32.mrf.mxu0 }
 0x13f   :  { %v926_v37 = vadd.f32 %v925_v18, %v731_v2  ;;  %v625_v49 = vadd.f32 %v4263_v13, %v464_v22 }
 0x140   :  { %v930_v61 = vpop.f32.mrf.mxu0 }
 0x141   :  { %v931_v55 = vadd.f32 %v930_v61, %v738_v42  ;;  %v756_v61 = vadd.f32 %v755_v23, %v623_v10 }
 0x142   :  { %v932_v29 = vpop.f32.mrf.mxu0 }
 0x143   :  { %v933_v26 = vadd.f32 %v932_v29, %v740_v58  ;;  %v617_v29 = vadd.f32 %v4253_v41, %v457_v50 }
 0x144   :  { %v1048_v51 = vpop.f32.mrf.mxu1  ;;  %v937_v21 = vpop.f32.mrf.mxu0 }
 0x145   :  { %v4269_v7 = vadd.f32 %v1048_v51, %v924_v63  ;;  %v938_v56 = vadd.f32 %v937_v21, %v747_v45  ;;  %v749_v35 = vadd.f32 %v4265_v11, %v617_v29  ;;  %v758_v45 = vadd.f32 %v4267_v47, %v625_v49 }
 0x146   :  { %v1050_v8 = vpop.f32.mrf.mxu1  ;;  %v939_v28 = vpop.f32.mrf.mxu0 }
 0x147   :  { %v1075_v30 = vrot.slane %v4269_v7, 5  ;;  %v1051_v48 = vadd.f32 %v1050_v8, %v926_v37  ;;  %v1083_v6 = vrot.slane %v4269_v7, 7  ;;  %v1095_v39 = vrot.slane %v4269_v7, 2 }
 0x148   :  { %v1055_v33 = vpop.f32.mrf.mxu1  ;;  %v944_v52 = vpop.f32.mrf.mxu0  ;;  %v940_v11 = vadd.f32 %v939_v28, %v749_v35 }
 0x149   :  { %v1155_v27 = vsel %vm1153_vm0, %v1051_v48, 0  ;;  %v1056_v15 = vadd.f32 %v1055_v33, %v931_v55  ;;  %v1077_v46 = vmax.f32 %v4269_v7, %v1075_v30  ;;  %v945_v2 = vadd.f32 %v944_v52, %v756_v61 }
 0x14a   :  { %v4276_v20 = vand.u32 4294901760, %v1155_v27  ;;  %v1057_v32 = vpop.f32.mrf.mxu1 }
 0x14b   :  { %v1079_v19 = vrot.slane %v1056_v15, 7  ;;  %v1085_v3 = vmax.f32 %v1056_v15, %v1083_v6  ;;  %v4283_v16 = vrot.slane %v1056_v15, 1  ;;  %v1058_v18 = vadd.f32 %v1057_v32, %v933_v26 }
 0x14c   :  { %v4281_v12 = vsub.f32 %v1155_v27, %v4276_v20  ;;  %v1062_v14 = vpop.f32.mrf.mxu1  ;;  %3180 = vmatprep.mubr.f32.mxu1 %v4276_v20  ;;  %v1090_v31 = vmax.f32 %v1056_v15, %v1075_v30  ;;  %v1091_v40 = vrot.slane %v1056_v15, 5  ;;  %v1097_v54 = vmax.f32 %v1077_v46, %v1095_v39 }
 0x14d   :  { %v1081_v17 = vmax.f32 %v1077_v46, %v1079_v19  ;;  %v1086_v34 = vmax.f32 %v1085_v3, %v1075_v30  ;;  %v1063_v25 = vadd.f32 %v1062_v14, %v938_v56  ;;  %v1158_v0 = vsel %vm1153_vm0, %v1058_v18, 0  ;;  %v946_v30 = vpop.f32.mrf.mxu0 }
 0x14e   :  { %v1064_v4 = vpop.f32.mrf.mxu1  ;;  %v1231_v53 = vand.u32 4294901760, %v4281_v12  ;;  %v1093_v42 = vmax.f32 %v1090_v31, %v1091_v40  ;;  %v4299_v8 = vand.u32 4294901760, %v1158_v0  ;;  %v947_v32 = vadd.f32 %v946_v30, %v758_v45 }
 0x14f   :  { %v1082_v1 = vmax.f32 %v1081_v17, %v1056_v15  ;;  %v1089_v43 = vmax.f32 %v1086_v34, %v4283_v16  ;;  %v1100_v44 = vrot.slane %v1063_v25, 5  ;;  %v1108_v37 = vrot.slane %v1063_v25, 7 }
 0x150   :  { %v1069_v63 = vpop.f32.mrf.mxu1  ;;  %v1120_v57 = vrot.slane %v1063_v25, 2  ;;  %v1232_v41 = vsub.f32 %v4281_v12, %v1231_v53  ;;  %v1094_v6 = vmax.f32 %v1093_v42, %v4283_v16  ;;  %v1065_v56 = vadd.f32 %v1064_v4, %v940_v11 }
 0x151   :  { %v1125_v9 = vrot.slane %v1082_v1, 1  ;;  %v1128_v23 = vrot.slane %v1089_v43, 4  ;;  %v1102_v51 = vmax.f32 %v1063_v25, %v1100_v44  ;;  %v1070_v21 = vadd.f32 %v1069_v63, %v945_v2 }
 0x152   :  { %v1233_v24 = vand.u32 4294901760, %v1232_v41  ;;  %v1071_v19 = vpop.f32.mrf.mxu1  ;;  %v1098_v3 = vmax.f32 %v1097_v54, %v4283_v16  ;;  %v4306_v5 = vsub.f32 %v1158_v0, %v4299_v8  ;;  %v1741_v34 = vsel %vm1153_vm0, %v1065_v56, 0 }
 0x153   :  { %v1140_v7 = vsel %vm1139_vm1, %v1125_v9, %v1128_v23  ;;  %v1104_v59 = vrot.slane %v1070_v21, 7  ;;  %v1110_v55 = vmax.f32 %v1070_v21, %v1108_v37  ;;  %v1122_v48 = vmax.f32 %v1102_v51, %v1120_v57 }
 0x154   :  { %v1112_v13 = vrot.slane %v1070_v21, 1  ;;  %v1115_v58 = vmax.f32 %v1070_v21, %v1100_v44  ;;  %v1116_v33 = vrot.slane %v1070_v21, 5  ;;  %v1142_v26 = vsel %vm1141_vm2, %v1140_v7, %v1094_v6  ;;  %3175 = vmatprep.mubr.f32.mxu0 %v1233_v24 }
 0x155   :  { %v1106_v27 = vmax.f32 %v1102_v51, %v1104_v59  ;;  %v1111_v15 = vmax.f32 %v1110_v55, %v1100_v44  ;;  %v1144_v52 = vsel %vm1143_vm3, %v1142_v26, %v1098_v3  ;;  %v1072_v17 = vadd.f32 %v1071_v19, %v947_v32 }
 0x156   :  { %v1118_v38 = vmax.f32 %v1115_v58, %v1116_v33  ;;  %v1123_v28 = vmax.f32 %v1122_v48, %v1112_v13  ;;  %v1241_v16 = vand.u32 4294901760, %v4306_v5  ;;  %v4312_v40 = vand.u32 4294901760, %v1741_v34 }
 0x157   :  { %v1107_v46 = vmax.f32 %v1106_v27, %v1070_v21  ;;  %v1114_v14 = vmax.f32 %v1111_v15, %v1112_v13  ;;  %v1744_v1 = vsel %vm1153_vm0, %v1072_v17, 0 }
 0x158   :  { %v1119_v47 = vmax.f32 %v1118_v38, %v1112_v13  ;;  %v1137_v50 = vrot.slane %v1123_v28, 4  ;;  %v1242_v22 = vsub.f32 %v4306_v5, %v1241_v16  ;;  %v4321_v39 = vand.u32 4294901760, %v1744_v1 }
 0x159   :  { %v1131_v10 = vrot.slane %v1107_v46, 5  ;;  %v1815_v63 = vsub.f32 %v1741_v34, %v4312_v40 }
 0x15a   :  { %v1134_v18 = vrot.slane %v1119_v47, 4  ;;  %v1243_v0 = vand.u32 4294901760, %v1242_v22  ;;  %v1825_v49 = vsub.f32 %v1744_v1, %v4321_v39 }
 0x15b   :  { %v1146_v25 = vsel %vm1145_vm4, %v1144_v52, %v1131_v10  ;;  %v1816_v37 = vand.u32 4294901760, %v1815_v63 }
 0x15c   :  { %v1148_v61 = vsel %vm1147_vm5, %v1146_v25, %v1114_v14  ;;  %v1826_v54 = vand.u32 4294901760, %v1825_v49 }
 0x15d   :  { %v1150_v31 = vsel %vm1149_vm6, %v1148_v61, %v1134_v18  ;;  %v1817_v57 = vsub.f32 %v1815_v63, %v1816_v37 }
 0x15e   :  { %v4314_v4 = vsel %vm1151_vm7, %v1150_v31, %v1137_v50  ;;  %v1827_v7 = vsub.f32 %v1825_v49, %v1826_v54 }
 0x15f   :  { %v1161_v43 = vsel %vm1153_vm0, %v4314_v4, 0  ;;  %v1739_v44 = vrot.slane %v4314_v4, 4  ;;  %v1818_v59 = vand.u32 4294901760, %v1817_v57 }
 0x160   :  { %v1194_v29 = vand.u32 4294901760, %v1161_v43  ;;  %v1828_v30 = vand.u32 4294901760, %v1827_v7 }
 0x161   :  { %v1746_v2 = vsel %vm1153_vm0, %v1739_v44, 0 }
 0x162   :  { %3173 = vmatprep.subr.mxu0 %v1194_v29  ;;  %v1281_v9 = vsub.f32 %v1161_v43, %v1194_v29  ;;  %v1779_v23 = vand.u32 4294901760, %v1746_v2 }
 0x163   :  { %3174 = vmatpush3.xpose.msra.mxu0 %v1194_v29 }
 0x164   :  { %3183 = vmatprep.subr.mxu0 %v1281_v9  ;;  %v1282_v51 = vand.u32 4294901760, %v1281_v9  ;;  %v1866_v21 = vsub.f32 %v1746_v2, %v1779_v23 }
 0x166   :  { %3176 = vmatmul.mubr.f32.vlgmr.msra.gmra.mxu0 %v1243_v0  ;;  %v1283_v42 = vsub.f32 %v1281_v9, %v1282_v51  ;;  %v1867_v41 = vand.u32 4294901760, %v1866_v21 }
 0x167   :  { %3184 = vmatpush3.xpose.msra.mxu0 %v1281_v9  ;;  %3185 = vmatprep.mubr.f32.mxu0 %v4281_v12 }
 0x168   :  { %3193 = vmatprep.subr.mxu0 %v1282_v51  ;;  %v1284_v35 = vand.u32 4294901760, %v1283_v42  ;;  %v1868_v55 = vsub.f32 %v1866_v21, %v1867_v41 }
 0x16a   :  { %3178 = vmatprep.subr.mxu1 %v1284_v35  ;;  %3186 = vmatmul.mubr.f32.vlgmr.msra.gmra.mxu0 %v4306_v5  ;;  %v1869_v48 = vand.u32 4294901760, %v1868_v55 }
 0x16b   :  { %3179 = vmatpush3.xpose.msra.mxu1 %v1284_v35  ;;  %3194 = vmatpush3.xpose.msra.mxu0 %v1282_v51 }
 0x16c   :  { %3195 = vmatprep.mubr.f32.mxu0 %v4276_v20  ;;  %3188 = vmatprep.subr.mxu1 %v1194_v29 }
 0x16d   :  { %3203 = vmatprep.subr.mxu0 %v1779_v23 }
 0x16e   :  { %3181 = vmatmul.mubr.f32.vlgmr.msra.gmra.mxu1 %v4299_v8  ;;  %3196 = vmatmul.mubr.f32.vlgmr.msra.gmra.mxu0 %v4299_v8 }
 0x16f   :  { %3189 = vmatpush3.xpose.msra.mxu1 %v1194_v29  ;;  %3190 = vmatprep.mubr.f32.mxu1 %v1231_v53 }
 0x170   :  { %3204 = vmatpush3.xpose.msra.mxu0 %v1779_v23  ;;  %3205 = vmatprep.mubr.f32.mxu0 %v1818_v59 }
 0x171   :  { %3198 = vmatprep.subr.mxu1 %v1194_v29  ;;  %3213 = vmatprep.subr.mxu0 %v1866_v21 }
 0x172   :  { %3191 = vmatmul.mubr.f32.vlgmr.msra.gmra.mxu1 %v1241_v16 }
 0x173   :  { %3206 = vmatmul.mubr.f32.vlgmr.msra.gmra.mxu0 %v1828_v30  ;;  %3199 = vmatpush3.xpose.msra.mxu1 %v1194_v29 }
 0x174   :  { %3200 = vmatprep.mubr.f32.mxu1 %v4276_v20  ;;  %3214 = vmatpush3.xpose.msra.mxu0 %v1866_v21 }
 0x175   :  { %3215 = vmatprep.mubr.f32.mxu0 %v1815_v63  ;;  %3208 = vmatprep.subr.mxu1 %v1869_v48 }
 0x176   :  { %3223 = vmatprep.subr.mxu0 %v1867_v41  ;;  %3201 = vmatmul.mubr.f32.vlgmr.msra.gmra.mxu1 %v4299_v8 }
 0x177   :  { %3216 = vmatmul.mubr.f32.vlgmr.msra.gmra.mxu0 %v1825_v49  ;;  %3209 = vmatpush3.xpose.msra.mxu1 %v1869_v48 }
 0x178   :  { %3210 = vmatprep.mubr.f32.mxu1 %v4312_v40  ;;  %3224 = vmatpush3.xpose.msra.mxu0 %v1867_v41 }
 0x179   :  { %3225 = vmatprep.mubr.f32.mxu0 %v4312_v40  ;;  %3218 = vmatprep.subr.mxu1 %v1779_v23 }
 0x17a   :  { %3211 = vmatmul.mubr.f32.vlgmr.msra.gmra.mxu1 %v4321_v39 }
 0x17b   :  { %3226 = vmatmul.mubr.f32.vlgmr.msra.gmra.mxu0 %v4321_v39  ;;  %3219 = vmatpush3.xpose.msra.mxu1 %v1779_v23 }
 0x17c   :  { %3220 = vmatprep.mubr.f32.mxu1 %v1816_v37  ;;  %3228 = vmatprep.subr.mxu1 %v1779_v23 }
 0x17e   :  { %3221 = vmatmul.mubr.f32.vlgmr.msra.gmra.mxu1 %v1826_v54 }
 0x17f   :  { %3229 = vmatpush3.xpose.msra.mxu1 %v1779_v23  ;;  %3230 = vmatprep.mubr.f32.mxu1 %v4312_v40 }
 0x182   :  { %3231 = vmatmul.mubr.f32.vlgmr.msra.gmra.mxu1 %v4321_v39 }
 0x226   :  { %v3177_v20 = vpop.f32.mrf.mxu0 }
 0x228   :  { %v1235_v12 = vpop.f32.mrf.mxu0 }
 0x22a   :  { %v3187_v53 = vpop.f32.mrf.mxu0 }
 0x22c   :  { %v1401_v8 = vpop.f32.mrf.mxu0 }
 0x22e   :  { %v3182_v13 = vpop.f32.mrf.mxu1  ;;  %v3197_v58 = vpop.f32.mrf.mxu0 }
 0x22f   :  { %v1328_v33 = vadd.f32 %v3182_v13, %v3177_v20 }
 0x230   :  { %v1321_v45 = vpop.f32.mrf.mxu1  ;;  %v1564_v11 = vpop.f32.mrf.mxu0 }
 0x231   :  { %v1322_v6 = vadd.f32 %v1321_v45, %v1235_v12  ;;  %v1409_v27 = vadd.f32 %v3187_v53, %v1328_v33 }
 0x232   :  { %v3192_v15 = vpop.f32.mrf.mxu1 }
 0x233   :  { %v1491_v38 = vadd.f32 %v3192_v15, %v1409_v27  ;;  %v3207_v24 = vpop.f32.mrf.mxu0  ;;  %v1402_v26 = vadd.f32 %v1401_v8, %v1322_v6 }
 0x234   :  { %v1482_v32 = vpop.f32.mrf.mxu1 }
 0x235   :  { %v1483_v56 = vadd.f32 %v1482_v32, %v1402_v26  ;;  %v1820_v46 = vpop.f32.mrf.mxu0  ;;  %v1571_v3 = vadd.f32 %v3197_v58, %v1491_v38 }
 0x236   :  { %v3202_v19 = vpop.f32.mrf.mxu1 }
 0x237   :  { %v3217_v5 = vpop.f32.mrf.mxu0  ;;  %v1565_v47 = vadd.f32 %v1564_v11, %v1483_v56  ;;  %v1649_v17 = vadd.f32 %v3202_v19, %v1571_v3  ;;  %v3433_v11 = vmov 0  }
 0x238   :  { %v1642_v28 = vpop.f32.mrf.mxu1  ;;  %3378 = vset.pattern.permute.xlu0 %v3433_v11  ;;  %3374 = vset.pattern.permute.xlu1 %v3433_v11 }
 0x239   :  { %v1643_v10 = vadd.f32 %v1642_v28, %v1565_v47  ;;  %v1986_v14 = vpop.f32.mrf.mxu0  ;;  %v1656_v43 = vsel %vm1652_vm8, %v1649_v17, -inf  ;;  %v3436_v28 = vmov 3  }
 0x23a   :  { %v3212_v52 = vpop.f32.mrf.mxu1 }
 0x23b   :  { %v1913_v34 = vadd.f32 %v3212_v52, %v3207_v24  ;;  %v1653_v18 = vsel %vm1652_vm8, %v1643_v10, -inf  ;;  %v3227_v61 = vpop.f32.mrf.mxu0  ;;  %v2329_v52 = vld [vmem:[%s4611_s3 + $0x30] sm:$0xff] }
 0x23c   :  { %v1906_v25 = vpop.f32.mrf.mxu1  ;;  %1654 = vmax.xlane.f32.xlu0 %v1653_v18  ;;  %v4360_v18 = vand.u32 4294901760, %v2329_v52 }
 0x23d   :  { %v1907_v16 = vadd.f32 %v1906_v25, %v1820_v46  ;;  %v1994_v50 = vadd.f32 %v3217_v5, %v1913_v34  ;;  %v2149_v29 = vpop.f32.mrf.mxu0  ;;  %v3434_v46 = vmov 1   ;;  %v3435_v5 = vmov 2  }
 0x23e   :  { %v3222_v31 = vpop.f32.mrf.mxu1 }
 0x23f   :  { %v2076_v40 = vadd.f32 %v3222_v31, %v1994_v50  ;;  %v1987_v1 = vadd.f32 %v1986_v14, %v1907_v16  ;;  %v2330_v14 = vld [vmem:[%s4611_s3 + $0x38] sm:$0xff]  ;;  %v2327_v16 = vld [vmem:[%s4611_s3 + $0x20] sm:$0xff] }
 0x240   :  { %v2067_v44 = vpop.f32.mrf.mxu1  ;;  %1657 = vmax.xlane.f32.xlu0 %v1656_v43  ;;  %v4358_v34 = vand.u32 4294901760, %v2330_v14  ;;  %v2326_v50 = vld [vmem:[%s4611_s3 + $0x18] sm:$0xff] }
 0x241   :  { %v2068_v22 = vadd.f32 %v2067_v44, %v1987_v1  ;;  %v2156_v2 = vadd.f32 %v3227_v61, %v2076_v40  ;;  %v4370_v61 = vand.u32 4294901760, %v2327_v16  ;;  %v4372_v31 = vand.u32 4294901760, %v2326_v50 }
 0x242   :  { %v3232_v39 = vpop.f32.mrf.mxu1  ;;  %v4375_v40 = vsub.f32 %v2330_v14, %v4358_v34  ;;  %v4378_v1 = vsub.f32 %v2329_v52, %v4360_v18  ;;  %3233 = vmatprep.subr.mxu0 %v4358_v34 }
 0x243   :  { %v2150_v63 = vadd.f32 %v2149_v29, %v2068_v22  ;;  %v2234_v0 = vadd.f32 %v3232_v39, %v2156_v2  ;;  %v4385_v44 = vsub.f32 %v2327_v16, %v4370_v61  ;;  %v4388_v22 = vsub.f32 %v2326_v50, %v4372_v31  ;;  %3234 = vmatpush3.msra.mxu0 %v4358_v34 }
 0x244   :  { %v2227_v9 = vpop.f32.mrf.mxu1  ;;  %v4392_v29 = vand.u32 4294901760, %v4375_v40  ;;  %v4395_v39 = vand.u32 4294901760, %v4378_v1  ;;  %3235 = vmatprep.subr.mxu0 %v4360_v18 }
 0x245   :  { %v2228_v23 = vadd.f32 %v2227_v9, %v2150_v63  ;;  %v2240_v49 = vsel %vm1652_vm8, %v2234_v0, -inf  ;;  %v4402_v63 = vand.u32 4294901760, %v4385_v44  ;;  %3236 = vmatpush3.msra.mxu0 %v4360_v18 }
 0x246   :  { %v2484_v9 = vsub.f32 %v4375_v40, %v4392_v29 }
 0x247   :  { %v2237_v51 = vsel %vm1652_vm8, %v2228_v23, -inf }
 0x248   :  { %2238 = vmax.xlane.f32.xlu1 %v2237_v51  ;;  %v4412_v51 = vand.u32 4294901760, %v4388_v22 }
 0x24c   :  { %2241 = vmax.xlane.f32.xlu1 %v2240_v49  ;;  %v2485_v49 = vand.u32 4294901760, %v2484_v9 }
 0x24e   :  { %3255 = vmatprep.subr.mxu1 %v2485_v49 }
 0x24f   :  { %3256 = vmatpush3.msra.mxu1 %v2485_v49 }
 0x2c5   :  { %v1655_v42 = vpop.xlane.xlu0 %1654 }
 0x2c6   :  { %v1659_v37 = vsub.f32 %v1643_v10, %v1655_v42 }
 0x2c8   :  { %v1661_v21 = vmul.f32 1.442695, %v1659_v37  ;;  %v2505_v37 = vsub.f32 %v4385_v44, %v4402_v63 }
 0x2c9   :  { %v1658_v35 = vpop.xlane.xlu0 %1657 }
 0x2ca   :  { %3390 = vpow2.f32 %v1661_v21  ;;  %v1660_v54 = vsub.f32 %v1649_v17, %v1658_v35  ;;  %v2328_v17 = vld [vmem:[%s4611_s3 + $0x28] sm:$0xff]  ;;  %v2512_v35 = vsub.f32 %v4388_v22, %v4412_v51 }
 0x2cb   :  { %v4362_v25 = vand.u32 4294901760, %v2328_v17 }
 0x2cc   :  { %v1663_v57 = vmul.f32 1.442695, %v1660_v54  ;;  %v2506_v54 = vand.u32 4294901760, %v2505_v37 }
 0x2cd   :  { %v4381_v43 = vsub.f32 %v2328_v17, %v4362_v25  ;;  %3237 = vmatprep.subr.mxu0 %v4362_v25 }
 0x2ce   :  { %3392 = vpow2.f32 %v1663_v57  ;;  %3238 = vmatpush3.msra.mxu0 %v4362_v25  ;;  %v2513_v57 = vand.u32 4294901760, %v2512_v35 }
 0x2cf   :  { %v4398_v2 = vand.u32 4294901760, %v4381_v43  ;;  %3239 = vmatprep.subr.mxu0 %v4370_v61 }
 0x2d0   :  { %3240 = vmatpush3.msra.mxu0 %v4370_v61 }
 0x2d1   :  { %v2239_v41 = vpop.xlane.xlu1 %2238  ;;  %3241 = vmatprep.subr.mxu0 %v4372_v31 }
 0x2d2   :  { %v2243_v7 = vsub.f32 %v2228_v23, %v2239_v41  ;;  %v2491_v23 = vsub.f32 %v4378_v1, %v4395_v39  ;;  %3242 = vmatpush3.msra.mxu0 %v4372_v31 }
 0x2d4   :  { %v2245_v59 = vmul.f32 1.442695, %v2243_v7  ;;  %v2492_v42 = vand.u32 4294901760, %v2491_v23 }
 0x2d5   :  { %v2242_v55 = vpop.xlane.xlu1 %2241 }
 0x2d6   :  { %3394 = vpow2.f32 %v2245_v59  ;;  %v2244_v30 = vsub.f32 %v2234_v0, %v2242_v55  ;;  %v2498_v0 = vsub.f32 %v4381_v43, %v4398_v2  ;;  %3257 = vmatprep.subr.mxu1 %v2492_v42 }
 0x2d7   :  { %v3391_v48 = vpop.eup %3390  ;;  %3258 = vmatpush3.msra.mxu1 %v2492_v42 }
 0x2d8   :  { %v2247_v20 = vmul.f32 1.442695, %v2244_v30  ;;  %v1665_v12 = vsel %vm1652_vm8, %v3391_v48, 0.0  ;;  %v2499_v21 = vand.u32 4294901760, %v2498_v0  ;;  %v2325_v30 = vld [vmem:[%s4611_s3 + $0x10] sm:$0xff] }
 0x2d9   :  { %1666 = vadd.xlane.f32.xlu0 %v1665_v12 }
 0x2da   :  { %3396 = vpow2.f32 %v2247_v20  ;;  %3259 = vmatprep.subr.mxu1 %v2499_v21  ;;  %v2324_v20 = vld [vmem:[%s4611_s3 + $0x8] sm:$0xff] }
 0x2db   :  { %v3393_v53 = vpop.eup %3392  ;;  %3260 = vmatpush3.msra.mxu1 %v2499_v21 }
 0x2dc   :  { %v1668_v8 = vsel %vm1652_vm8, %v3393_v53, 0.0  ;;  %3261 = vmatprep.subr.mxu1 %v2506_v54 }
 0x2dd   :  { %1669 = vadd.xlane.f32.xlu1 %v1668_v8  ;;  %3262 = vmatpush3.msra.mxu1 %v2506_v54  ;;  %v1717_v8 = vsub.s32 2, %v4250_v62 }
 0x2de   :  { %3263 = vmatprep.subr.mxu1 %v2513_v57 }
 0x2df   :  { %3264 = vmatpush3.msra.mxu1 %v2513_v57 }
 0x2e3   :  { %v3395_v13 = vpop.eup %3394 }
 0x2e4   :  { %v2249_v58 = vsel %vm1652_vm8, %v3395_v13, 0.0 }
 0x2e5   :  { %2250 = vadd.xlane.f32.xlu0 %v2249_v58  ;;  %v2323_v58 = vld [vmem:[%s4611_s3] sm:$0xff]  ;;  %s3437_s3 = smov 64  }
 0x2e7   :  { %v3397_v33 = vpop.eup %3396 }
 0x2e8   :  { %v2252_v45 = vsel %vm1652_vm8, %v3397_v33, 0.0 }
 0x2e9   :  { %2253 = vadd.xlane.f32.xlu1 %v2252_v45 }
 0x362   :  { %v1667_v6 = vpop.xlane.xlu0 %1666 }
 0x363   :  { %3398 = vrcp.f32 %v1667_v6  ;;  %v1702_v6 = vrot.slane %v4314_v4, %v68_v60  ;;  %v1733_v60 = vsub.s32 3, %v4250_v62 }
 0x365   :  { %v1734_v52 = vrot.slane %v4314_v4, %v1733_v60 }
 0x366   :  { %v1670_v27 = vpop.xlane.xlu1 %1669 }
 0x367   :  { %3400 = vrcp.f32 %v1670_v27 }
 0x36e   :  { %v2251_v15 = vpop.xlane.xlu0 %2250 }
 0x36f   :  { %3402 = vrcp.f32 %v2251_v15 }
 0x370   :  { %v3399_v38 = vpop.eup %3398 }
 0x371   :  { %v1672_v24 = vmul.f32 %v3399_v38, %v3391_v48  ;;  %v4427_v48 = vand.u32 4294901760, %v2325_v30 }
 0x372   :  { %v2254_v32 = vpop.xlane.xlu1 %2253 }
 0x373   :  { %1677 = vperm.xlu0 %3378, %v1672_v24   ;;  %3404 = vrcp.f32 %v2254_v32  ;;  %v4433_v12 = vsub.f32 %v2325_v30, %v4427_v48  ;;  %3243 = vmatprep.subr.mxu0 %v4427_v48  ;;  %v1718_v32 = vrot.slane %v4314_v4, %v1717_v8 }
 0x374   :  { %v3401_v26 = vpop.eup %3400  ;;  %3244 = vmatpush3.msra.mxu0 %v4427_v48 }
 0x375   :  { %v1674_v56 = vmul.f32 %v3401_v26, %v3393_v53  ;;  %v4435_v53 = vand.u32 4294901760, %v2324_v20 }
 0x377   :  { %1682 = vperm.xlu1 %3374, %v1674_v56   ;;  %3386 = vset.pattern.permute.xlu0 %v3434_v46  ;;  %v4447_v45 = vsub.f32 %v2324_v20, %v4435_v53 }
 0x378   :  { %3245 = vmatprep.subr.mxu0 %v4435_v53 }
 0x379   :  { %3246 = vmatpush3.msra.mxu0 %v4435_v53  ;;  %v4459_v15 = vand.u32 4294901760, %v4447_v45 }
 0x37b   :  { %3375 = vset.pattern.permute.xlu1 %v3434_v46 }
 0x37c   :  { %v3403_v19 = vpop.eup %3402  ;;  %1696 = vperm.xlu1 %3375, %v1674_v56  }
 0x37d   :  { %v2256_v3 = vmul.f32 %v3403_v19, %v3395_v13 }
 0x37f   :  { %2276 = vperm.xlu0 %3386, %v2256_v3  }
 0x380   :  { %3376 = vset.pattern.permute.xlu1 %v3435_v5  ;;  %v3405_v47 = vpop.eup %3404 }
 0x381   :  { %1712 = vperm.xlu1 %3376, %v1674_v56   ;;  %v2258_v10 = vmul.f32 %v3405_v47, %v3397_v33  ;;  %v4444_v33 = vand.u32 4294901760, %v4433_v12 }
 0x383   :  { %3387 = vset.pattern.permute.xlu0 %v3435_v5  ;;  %v2519_v27 = vsub.f32 %v4433_v12, %v4444_v33 }
 0x384   :  { %2292 = vperm.xlu0 %3387, %v2256_v3  }
 0x385   :  { %3377 = vset.pattern.permute.xlu1 %v3436_v28  ;;  %v2520_v19 = vand.u32 4294901760, %v2519_v27 }
 0x386   :  { %1728 = vperm.xlu1 %3377, %v1674_v56  }
 0x387   :  { %3265 = vmatprep.subr.mxu1 %v2520_v19 }
 0x388   :  { %3389 = vset.pattern.permute.xlu0 %v3436_v28  ;;  %3266 = vmatpush3.msra.mxu1 %v2520_v19 }
 0x389   :  { %2312 = vperm.xlu0 %3389, %v2258_v10  }
 0x38a   :  { %3379 = vset.pattern.permute.xlu1 %v3434_v46 }
 0x38b   :  { %1692 = vperm.xlu1 %3379, %v1672_v24  }
 0x38f   :  { %3380 = vset.pattern.permute.xlu1 %v3435_v5 }
 0x390   :  { %1708 = vperm.xlu1 %3380, %v1672_v24  }
 0x394   :  { %3381 = vset.pattern.permute.xlu1 %v3436_v28 }
 0x395   :  { %1724 = vperm.xlu1 %3381, %v1672_v24   ;;  %v1688_v24 = vrot.slane %v4314_v4, %v64_v36 }
 0x399   :  { %3382 = vset.pattern.permute.xlu1 %v3433_v11 }
 0x39a   :  { %2266 = vperm.xlu1 %3382, %v2258_v10  }
 0x39e   :  { %3383 = vset.pattern.permute.xlu1 %v3434_v46 }
 0x39f   :  { %2280 = vperm.xlu1 %3383, %v2258_v10  }
 0x3a3   :  { %3384 = vset.pattern.permute.xlu1 %v3435_v5 }
 0x3a4   :  { %2296 = vperm.xlu1 %3384, %v2258_v10  }
 0x3a8   :  { %3385 = vset.pattern.permute.xlu1 %v3433_v11  ;;  %v4449_v11 = vand.u32 4294901760, %v2323_v58 }
 0x3a9   :  { %2261 = vperm.xlu1 %3385, %v2256_v3  }
 0x3aa   :  { %v4462_v38 = vsub.f32 %v2323_v58, %v4449_v11  ;;  %3247 = vmatprep.subr.mxu0 %v4449_v11 }
 0x3ab   :  { %3248 = vmatpush3.msra.mxu0 %v4449_v11 }
 0x3ac   :  { %v4474_v5 = vand.u32 4294901760, %v4462_v38  ;;  %3277 = vmatprep.subr.mxu0 %v4375_v40 }
 0x3ad   :  { %3388 = vset.pattern.permute.xlu1 %v3436_v28 }
 0x3ae   :  { %2308 = vperm.xlu1 %3388, %v2256_v3   ;;  %v2526_v3 = vsub.f32 %v4447_v45, %v4459_v15  ;;  %v2533_v10 = vsub.f32 %v4462_v38, %v4474_v5 }
 0x3b0   :  { %v2527_v28 = vand.u32 4294901760, %v2526_v3  ;;  %v2534_v16 = vand.u32 4294901760, %v2533_v10 }
 0x3b2   :  { %3267 = vmatprep.subr.mxu1 %v2527_v28 }
 0x3b3   :  { %3268 = vmatpush3.msra.mxu1 %v2527_v28 }
 0x3b4   :  { %3269 = vmatprep.subr.mxu1 %v2534_v16 }
 0x3b5   :  { %3270 = vmatpush3.msra.mxu1 %v2534_v16 }
 0x3b6   :  { %3299 = vmatprep.subr.mxu1 %v4358_v34 }
 0x3ee   :  { %v1678_v26 = vpop.permute.xlu0 %1677 }
 0x3ef   :  { %v1689_v47 = vmul.f32 %v1688_v24, %v1678_v26 }
 0x3f2   :  { %v1683_v41 = vpop.permute.xlu1 %1682 }
 0x3f3   :  { %v1690_v9 = vmul.f32 %v1688_v24, %v1683_v41  ;;  %v2271_v41 = vsub.s32 4, %v4250_v62 }
 0x3f5   :  { %v2272_v58 = vrot.slane %v4314_v4, %v2271_v41 }
 0x3f7   :  { %v1697_v7 = vpop.permute.xlu1 %1696 }
 0x3f8   :  { %v1704_v14 = vmul.f32 %v1702_v6, %v1697_v7  ;;  %v2285_v7 = vsub.s32 5, %v4250_v62 }
 0x3fa   :  { %v1706_v42 = vadd.f32 %v1704_v14, %v1690_v9  ;;  %v2277_v37 = vpop.permute.xlu0 %2276  ;;  %v2286_v20 = vrot.slane %v4314_v4, %v2285_v7 }
 0x3fc   :  { %v1713_v59 = vpop.permute.xlu1 %1712  ;;  %v2287_v28 = vmul.f32 %v2286_v20, %v2277_v37 }
 0x3fd   :  { %v1720_v23 = vmul.f32 %v1718_v32, %v1713_v59 }
 0x3ff   :  { %v1722_v54 = vadd.f32 %v1720_v23, %v1706_v42  ;;  %v2293_v59 = vpop.permute.xlu0 %2292 }
 0x401   :  { %v1729_v55 = vpop.permute.xlu1 %1728 }
 0x402   :  { %v1736_v21 = vmul.f32 %v1734_v52, %v1729_v55  ;;  %v2301_v55 = vsub.s32 6, %v4250_v62 }
 0x404   :  { %v1738_v30 = vadd.f32 %v1736_v21, %v1722_v54  ;;  %v2302_v27 = vrot.slane %v4314_v4, %v2301_v55  ;;  %v2313_v26 = vpop.permute.xlu0 %2312 }
 0x406   :  { %v1693_v13 = vpop.permute.xlu1 %1692 }
 0x407   :  { %v1703_v56 = vmul.f32 %v1702_v6, %v1693_v13  ;;  %v2317_v13 = vsub.s32 7, %v4250_v62  ;;  %v2303_v62 = vmul.f32 %v2302_v27, %v2293_v59 }
 0x409   :  { %v1705_v17 = vadd.f32 %v1703_v56, %v1689_v47  ;;  %v2318_v60 = vrot.slane %v4314_v4, %v2317_v13 }
 0x40b   :  { %v1709_v46 = vpop.permute.xlu1 %1708  ;;  %v2320_v19 = vmul.f32 %v2318_v60, %v2313_v26 }
 0x40c   :  { %v1719_v36 = vmul.f32 %v1718_v32, %v1709_v46 }
 0x40e   :  { %v1721_v0 = vadd.f32 %v1719_v36, %v1705_v17 }
 0x410   :  { %v1725_v50 = vpop.permute.xlu1 %1724 }
 0x411   :  { %v1735_v49 = vmul.f32 %v1734_v52, %v1725_v50 }
 0x413   :  { %v1737_v35 = vadd.f32 %v1735_v49, %v1721_v0 }
 0x415   :  { %v2267_v57 = vpop.permute.xlu1 %2266  ;;  %2335 = vrot.lane.b32.xlu1 %v1737_v35, %s3437_s3 }
 0x416   :  { %v2274_v24 = vmul.f32 %v2272_v58, %v2267_v57 }
 0x419   :  { %2337 = vrot.lane.b32.xlu1 %v1738_v30, %s3437_s3 }
 0x41a   :  { %v2281_v8 = vpop.permute.xlu1 %2280 }
 0x41b   :  { %v2288_v6 = vmul.f32 %v2286_v20, %v2281_v8 }
 0x41d   :  { %v2290_v56 = vadd.f32 %v2288_v6, %v2274_v24 }
 0x41f   :  { %v2297_v32 = vpop.permute.xlu1 %2296 }
 0x420   :  { %v2304_v46 = vmul.f32 %v2302_v27, %v2297_v32 }
 0x422   :  { %v2306_v3 = vadd.f32 %v2304_v46, %v2290_v56 }
 0x424   :  { %v2262_v47 = vpop.permute.xlu1 %2261  ;;  %v2322_v36 = vadd.f32 %v2320_v19, %v2306_v3 }
 0x425   :  { %v2273_v10 = vmul.f32 %v2272_v58, %v2262_v47 }
 0x426   :  { %2341 = vrot.lane.b32.xlu1 %v2322_v36, %s3437_s3 }
 0x427   :  { %v2289_v14 = vadd.f32 %v2287_v28, %v2273_v10 }
 0x429   :  { %v2309_v52 = vpop.permute.xlu1 %2308  ;;  %v2305_v17 = vadd.f32 %v2303_v62, %v2289_v14  ;;  %v3063_v62 = vld [vmem:[%s4612_s4] ss:$0 sm:$0xff] }
 0x42a   :  { %v2319_v16 = vmul.f32 %v2318_v60, %v2309_v52 }
 0x42c   :  { %v2321_v50 = vadd.f32 %v2319_v16, %v2305_v17 }
 0x42e   :  { %2339 = vrot.lane.b32.xlu0 %v2321_v50, %s3437_s3 }
 0x487   :  { %v2336_v9 = vpop.permute.xlu1 %2335 }
 0x488   :  { %v2343_v4 = vsel %vm1153_vm0, %v2336_v9, 0 }
 0x489   :  { %v4494_v23 = vand.u32 4294901760, %v2343_v4 }
 0x48b   :  { %v4497_v0 = vsub.f32 %v2343_v4, %v4494_v23  ;;  %3271 = vmatprep.mubr.f32.mxu1 %v4494_v23  ;;  %v2338_v49 = vpop.permute.xlu1 %2337 }
 0x48c   :  { %v2345_v42 = vsel %vm1153_vm0, %v2338_v49, 0 }
 0x48d   :  { %v2426_v37 = vand.u32 4294901760, %v4497_v0  ;;  %v4502_v21 = vand.u32 4294901760, %v2345_v42 }
 0x48f   :  { %v4505_v35 = vsub.f32 %v2345_v42, %v4502_v21  ;;  %3272 = vmatmul.mubr.f32.vlgmr.msra.gmra.mxu1 %v4502_v21  ;;  %v2427_v54 = vsub.f32 %v4497_v0, %v2426_v37  ;;  %v3064_v42 = vld [vmem:[%s4613_s5] ss:$0 sm:$0xff] }
 0x490   :  { %3300 = vmatpush3.msra.mxu1 %v4358_v34 }
 0x491   :  { %v2436_v57 = vand.u32 4294901760, %v4505_v35  ;;  %v2428_v7 = vand.u32 4294901760, %v2427_v54  ;;  %3301 = vmatprep.subr.mxu1 %v4360_v18 }
 0x492   :  { %3302 = vmatpush3.msra.mxu1 %v4360_v18 }
 0x493   :  { %v2437_v30 = vsub.f32 %v4505_v35, %v2436_v57  ;;  %3249 = vmatprep.mubr.f32.mxu0 %v2428_v7  ;;  %3303 = vmatprep.subr.mxu1 %v4362_v25 }
 0x494   :  { %3304 = vmatpush3.msra.mxu1 %v4362_v25 }
 0x495   :  { %v2438_v41 = vand.u32 4294901760, %v2437_v30  ;;  %3305 = vmatprep.subr.mxu1 %v4370_v61 }
 0x496   :  { %3306 = vmatpush3.msra.mxu1 %v4370_v61 }
 0x497   :  { %3250 = vmatmul.mubr.f32.vlgmr.msra.gmra.mxu0 %v2438_v41  ;;  %3307 = vmatprep.subr.mxu1 %v4372_v31 }
 0x498   :  { %v2342_v59 = vpop.permute.xlu1 %2341  ;;  %3278 = vmatpush3.msra.mxu0 %v4375_v40  ;;  %3308 = vmatpush3.msra.mxu1 %v4372_v31 }
 0x499   :  { %v2349_v20 = vsel %vm1153_vm0, %v2342_v59, 0  ;;  %3279 = vmatprep.subr.mxu0 %v4378_v1  ;;  %3309 = vmatprep.subr.mxu1 %v4427_v48  ;;  %v3407_v59 = vld [vmem:[%s4608_s0] sm:$0xff] }
 0x49a   :  { %3280 = vmatpush3.msra.mxu0 %v4378_v1  ;;  %3310 = vmatpush3.msra.mxu1 %v4427_v48  ;;  %v4526_v55 = vand.u32 4294901760, %v2349_v20 }
 0x49b   :  { %3281 = vmatprep.subr.mxu0 %v4381_v43  ;;  %3311 = vmatprep.subr.mxu1 %v4435_v53 }
 0x49c   :  { %3282 = vmatpush3.msra.mxu0 %v4381_v43  ;;  %3312 = vmatpush3.msra.mxu1 %v4435_v53  ;;  %v2455_v40 = vsub.f32 %v2349_v20, %v4526_v55 }
 0x49d   :  { %3283 = vmatprep.subr.mxu0 %v4385_v44  ;;  %3313 = vmatprep.subr.mxu1 %v4449_v11 }
 0x49e   :  { %3284 = vmatpush3.msra.mxu0 %v4385_v44  ;;  %3314 = vmatpush3.msra.mxu1 %v4449_v11  ;;  %v2456_v13 = vand.u32 4294901760, %v2455_v40 }
 0x49f   :  { %3285 = vmatprep.subr.mxu0 %v4388_v22  ;;  %3343 = vmatprep.subr.mxu1 %v4358_v34 }
 0x4a0   :  { %v2340_v1 = vpop.permute.xlu0 %2339  ;;  %3286 = vmatpush3.msra.mxu0 %v4388_v22  ;;  %v2457_v58 = vsub.f32 %v2455_v40, %v2456_v13 }
 0x4a1   :  { %v2347_v43 = vsel %vm1153_vm0, %v2340_v1, 0  ;;  %3287 = vmatprep.subr.mxu0 %v4433_v12 }
 0x4a2   :  { %v2444_v8 = vand.u32 4294901760, %v2347_v43  ;;  %3288 = vmatpush3.msra.mxu0 %v4433_v12 }
 0x4a3   :  { %3289 = vmatprep.subr.mxu0 %v4447_v45 }
 0x4a4   :  { %v2445_v44 = vsub.f32 %v2347_v43, %v2444_v8  ;;  %3274 = vmatprep.mubr.f32.mxu1 %v2444_v8  ;;  %3290 = vmatpush3.msra.mxu0 %v4447_v45  ;;  %v2458_v45 = vand.u32 4294901760, %v2457_v58  ;;  %v3408_v43 = vld [vmem:[%s4608_s0 + $0x18] sm:$0xff] }
 0x4a5   :  { %3275 = vmatmul.mubr.f32.gmra.mxu1 %v4526_v55  ;;  %3291 = vmatprep.subr.mxu0 %v4462_v38 }
 0x4a6   :  { %3315 = vmatprep.mubr.f32.mxu1 %v2426_v37  ;;  %v2446_v22 = vand.u32 4294901760, %v2445_v44  ;;  %3292 = vmatpush3.msra.mxu0 %v4462_v38 }
 0x4a7   :  { %3321 = vmatprep.subr.mxu0 %v4392_v29 }
 0x4a8   :  { %v2447_v6 = vsub.f32 %v2445_v44, %v2446_v22 }
 0x4a9   :  { %3316 = vmatmul.mubr.f32.vlgmr.msra.gmra.mxu1 %v2436_v57 }
 0x4aa   :  { %3344 = vmatpush3.msra.mxu1 %v4358_v34  ;;  %3318 = vmatprep.mubr.f32.mxu1 %v2446_v22  ;;  %v2448_v12 = vand.u32 4294901760, %v2447_v6  ;;  %v3409_v22 = vld [vmem:[%s4608_s0 + $0x10] sm:$0xff] }
 0x4ab   :  { %3345 = vmatprep.subr.mxu1 %v4360_v18 }
 0x4ac   :  { %3346 = vmatpush3.msra.mxu1 %v4360_v18  ;;  %3252 = vmatprep.mubr.f32.mxu0 %v2448_v12 }
 0x4ad   :  { %3347 = vmatprep.subr.mxu1 %v4362_v25  ;;  %3253 = vmatmul.mubr.f32.gmra.mxu0 %v2458_v45 }
 0x4ae   :  { %3319 = vmatmul.mubr.f32.gmra.mxu1 %v2456_v13  ;;  %3293 = vmatprep.mubr.f32.mxu0 %v4497_v0 }
 0x4af   :  { %3348 = vmatpush3.msra.mxu1 %v4362_v25  ;;  %3359 = vmatprep.mubr.f32.mxu1 %v4494_v23 }
 0x4b0   :  { %3349 = vmatprep.subr.mxu1 %v4370_v61 }
 0x4b1   :  { %3350 = vmatpush3.msra.mxu1 %v4370_v61  ;;  %3294 = vmatmul.mubr.f32.vlgmr.msra.gmra.mxu0 %v4505_v35 }
 0x4b2   :  { %3351 = vmatprep.subr.mxu1 %v4372_v31  ;;  %3322 = vmatpush3.msra.mxu0 %v4392_v29 }
 0x4b3   :  { %3352 = vmatpush3.msra.mxu1 %v4372_v31  ;;  %3296 = vmatprep.mubr.f32.mxu0 %v2445_v44 }
 0x4b4   :  { %3323 = vmatprep.subr.mxu0 %v4395_v39  ;;  %3353 = vmatprep.subr.mxu1 %v4427_v48 }
 0x4b5   :  { %3324 = vmatpush3.msra.mxu0 %v4395_v39  ;;  %3354 = vmatpush3.msra.mxu1 %v4427_v48 }
 0x4b6   :  { %3325 = vmatprep.subr.mxu0 %v4398_v2  ;;  %3355 = vmatprep.subr.mxu1 %v4435_v53 }
 0x4b7   :  { %3297 = vmatmul.mubr.f32.gmra.mxu0 %v2455_v40  ;;  %3356 = vmatpush3.msra.mxu1 %v4435_v53 }
 0x4b8   :  { %3326 = vmatpush3.msra.mxu0 %v4398_v2  ;;  %3337 = vmatprep.mubr.f32.mxu0 %v4494_v23 }
 0x4b9   :  { %3327 = vmatprep.subr.mxu0 %v4402_v63  ;;  %3357 = vmatprep.subr.mxu1 %v4449_v11 }
 0x4ba   :  { %3328 = vmatpush3.msra.mxu0 %v4402_v63  ;;  %3358 = vmatpush3.msra.mxu1 %v4449_v11 }
 0x4bb   :  { %3329 = vmatprep.subr.mxu0 %v4412_v51  ;;  %3360 = vmatmul.mubr.f32.vlgmr.msra.gmra.mxu1 %v4502_v21 }
 0x4bc   :  { %3330 = vmatpush3.msra.mxu0 %v4412_v51  ;;  %3362 = vmatprep.mubr.f32.mxu1 %v2444_v8 }
 0x4bd   :  { %3331 = vmatprep.subr.mxu0 %v4444_v33 }
 0x4be   :  { %3332 = vmatpush3.msra.mxu0 %v4444_v33 }
 0x4bf   :  { %3333 = vmatprep.subr.mxu0 %v4459_v15  ;;  %3363 = vmatmul.mubr.f32.gmra.mxu1 %v4526_v55 }
 0x4c0   :  { %3334 = vmatpush3.msra.mxu0 %v4459_v15 }
 0x4c1   :  { %3335 = vmatprep.subr.mxu0 %v4474_v5 }
 0x4c2   :  { %3336 = vmatpush3.msra.mxu0 %v4474_v5 }
 0x4c3   :  { %3338 = vmatmul.mubr.f32.vlgmr.msra.gmra.mxu0 %v4502_v21  ;;  %v3406_v21 = vld [vmem:[%s4608_s0 + $0x8] sm:$0xff] }
 0x4c4   :  { %3340 = vmatprep.mubr.f32.mxu0 %v2444_v8 }
 0x4c7   :  { %3341 = vmatmul.mubr.f32.gmra.mxu0 %v4526_v55 }
 0x54f   :  { %v3273_v34 = vpop.f32.mrf.mxu1 }
 0x551   :  { %v2571_v18 = vpop.f32.mrf.mxu1 }
 0x557   :  { %v3251_v25 = vpop.f32.mrf.mxu0 }
 0x558   :  { %v2578_v11 = vadd.f32 %v3273_v34, %v3251_v25 }
 0x559   :  { %v2430_v31 = vpop.f32.mrf.mxu0 }
 0x55a   :  { %v2572_v5 = vadd.f32 %v2571_v18, %v2430_v31 }
 0x565   :  { %v3276_v61 = vpop.f32.mrf.mxu1 }
 0x567   :  { %v2583_v29 = vpop.f32.mrf.mxu1 }
 0x569   :  { %v3317_v2 = vpop.f32.mrf.mxu1 }
 0x56b   :  { %v2779_v51 = vpop.f32.mrf.mxu1 }
 0x56d   :  { %v3254_v39 = vpop.f32.mrf.mxu0 }
 0x56e   :  { %v3320_v53 = vpop.f32.mrf.mxu1  ;;  %v2590_v26 = vadd.f32 %v3276_v61, %v3254_v39 }
 0x56f   :  { %v2450_v63 = vpop.f32.mrf.mxu0 }
 0x570   :  { %v2795_v15 = vpop.f32.mrf.mxu1  ;;  %v2584_v56 = vadd.f32 %v2583_v29, %v2450_v63 }
 0x571   :  { %v3295_v48 = vpop.f32.mrf.mxu0 }
 0x572   :  { %v2685_v27 = vadd.f32 %v3295_v48, %v2578_v11 }
 0x573   :  { %v2677_v33 = vpop.f32.mrf.mxu0 }
 0x574   :  { %v2678_v32 = vadd.f32 %v2677_v33, %v2572_v5  ;;  %v2788_v19 = vadd.f32 %v3317_v2, %v2685_v27 }
 0x576   :  { %v2780_v10 = vadd.f32 %v2779_v51, %v2678_v32 }
 0x577   :  { %v3298_v38 = vpop.f32.mrf.mxu0 }
 0x578   :  { %v2699_v46 = vadd.f32 %v3298_v38, %v2590_v26 }
 0x579   :  { %v2691_v60 = vpop.f32.mrf.mxu0 }
 0x57a   :  { %v2692_v36 = vadd.f32 %v2691_v60, %v2584_v56  ;;  %v2804_v16 = vadd.f32 %v3320_v53, %v2699_v46 }
 0x57b   :  { %v3361_v24 = vpop.f32.mrf.mxu1 }
 0x57c   :  { %v2796_v49 = vadd.f32 %v2795_v15, %v2692_v36 }
 0x57d   :  { %v2995_v3 = vpop.f32.mrf.mxu1 }
 0x57f   :  { %v3364_v50 = vpop.f32.mrf.mxu1 }
 0x581   :  { %v3007_v30 = vpop.f32.mrf.mxu1 }
 0x583   :  { %v3339_v47 = vpop.f32.mrf.mxu0 }
 0x584   :  { %v2905_v28 = vadd.f32 %v3339_v47, %v2788_v19 }
 0x585   :  { %v2898_v14 = vpop.f32.mrf.mxu0 }
 0x586   :  { %v3002_v52 = vadd.f32 %v3361_v24, %v2905_v28  ;;  %v2899_v17 = vadd.f32 %v2898_v14, %v2780_v10 }
 0x587   :  { %v3342_v9 = vpop.f32.mrf.mxu0 }
 0x588   :  { %v3025_v4 = vmul.f32 %v3063_v62, %v3002_v52  ;;  %v2996_v23 = vadd.f32 %v2995_v3, %v2899_v17  ;;  %v2917_v0 = vadd.f32 %v3342_v9, %v2804_v16 }
 0x589   :  { %v2910_v37 = vpop.f32.mrf.mxu0 }
 0x58a   :  { %v3029_v35 = vadd.f32 %v3406_v21, %v3025_v4  ;;  %v3024_v54 = vmul.f32 %v3063_v62, %v2996_v23  ;;  %v3014_v57 = vadd.f32 %v3364_v50, %v2917_v0  ;;  %v2911_v7 = vadd.f32 %v2910_v37, %v2796_v49 }
 0x58c   :  { %v3040_v41 = vadd.f32 %v3064_v42, %v3029_v35  ;;  %v3028_v20 = vadd.f32 %v3407_v59, %v3024_v54  ;;  %v3027_v55 = vmul.f32 %v3063_v62, %v3014_v57  ;;  %v3008_v40 = vadd.f32 %v3007_v30, %v2911_v7 }
 0x58e   :  { %3044 = vst [vmem:[#allocation2 + $0x8] sm:$0xff] %v3040_v41  ;;  %v3039_v1 = vadd.f32 %v3064_v42, %v3028_v20  ;;  %v3031_v8 = vadd.f32 %v3408_v43, %v3027_v55  ;;  %v3026_v13 = vmul.f32 %v3063_v62, %v3008_v40 }
 0x590   :  { %3043 = vst [vmem:[#allocation2] sm:$0xff] %v3039_v1  ;;  %v3042_v44 = vadd.f32 %v3064_v42, %v3031_v8  ;;  %v3030_v58 = vadd.f32 %v3409_v22, %v3026_v13 }
 0x592   :  { %3046 = vst [vmem:[#allocation2 + $0x18] sm:$0xff] %v3042_v44  ;;  %v3041_v6 = vadd.f32 %v3064_v42, %v3030_v58 }
 0x594   :  { %3045 = vst [vmem:[#allocation2 + $0x10] sm:$0xff] %v3041_v6 }
 0x595   :  { %3421 = shalt.err (!%p3418_p4)
}
 0x596   :  { %s3439_s24 = smov 128   ;;  %s3440_s25 = smov 8  }
 0x597   :  { %3058 = dma.vmem_to_hbm [thread:$0]  %s3053_s21, 512, %s4614_s6, [#allocation3], %s3439_s24, %s3439_s24, %s3440_s25  }
 0x598   :  { %3430 = dma.done.wait [#allocation3], 512  }
 0x599   :  { %3431 = vsyncadd [#allocation3], 4294966784 }
 0x59a   :  { %3062 = vsyncpa [#allocation3], 1 }

</bundles_post_ra>
